<compile_context>
chip_gen: v7x
topology: tpu7x:2x2x1
jax: 0.10.0
libtpu: 0.0.40
codegen_flags: <defaults>
</compile_context>

<pallas_src>
import jax
import jax.numpy as jnp
from jax.experimental import pallas as pl
from jax.experimental.pallas import tpu as pltpu


# --------------------------------------------------------------------------- #
# Kernel 1: concat attention + softmax + context + single-step GRU (f32)
# --------------------------------------------------------------------------- #
def attn_gru_state_kernel(
    emb_ref, hprev_ref, enc_ref,
    u_h_ref, u_e_ref, c_ref,
    w_ih_emb_ref, w_ih_ctx_ref, b_ih_ref,
    w_hh_ref, b_hh_ref,
    hnew_ref, attn_ref,
):
    H = hprev_ref.shape[1]              # padded hidden size (multiple of 128)

    emb = emb_ref[...]                  # (B, H)
    h_prev = hprev_ref[...]             # (B, H)
    enc = enc_ref[...]                  # (B, L, H)

    # folded concat attention (no tanh in the reference Attn.score):
    #   energy[b, l] = v . (W [h_b ; e_{b,l}] + b_attn) = h_b.u_h + e_{b,l}.u_e + c
    hid_e = jnp.sum(h_prev * u_h_ref[...], axis=-1, keepdims=True)        # (B, 1)
    enc_e = jnp.sum(enc * u_e_ref[...][:, None, :], axis=-1)              # (B, L)
    energy = enc_e + hid_e + c_ref[0, 0]                                  # (B, L)

    # softmax over L (dim=1 in the PyTorch code)
    m = jnp.max(energy, axis=-1, keepdims=True)
    e = jnp.exp(energy - m)
    attn_w = e / jnp.sum(e, axis=-1, keepdims=True)                       # (B, L)
    attn_ref[...] = attn_w

    # context = attn_weights.bmm(encoder_outputs)
    context = jnp.sum(attn_w[:, :, None] * enc, axis=1)                   # (B, H)

    # rnn_input = relu(cat(emb, context)); relu distributes over the concat,
    # inputs pre-split so there is no lane-offset concatenation.
    ri_e = jnp.maximum(emb, 0.0)
    ri_c = jnp.maximum(context, 0.0)

    # single-step GRU, PyTorch gate order (r, z, n); weights pre-transposed.
    gi = (jnp.dot(ri_e, w_ih_emb_ref[...], preferred_element_type=jnp.float32)
          + jnp.dot(ri_c, w_ih_ctx_ref[...], preferred_element_type=jnp.float32)
          + b_ih_ref[...])                                                # (B, 3H)
    gh = (jnp.dot(h_prev, w_hh_ref[...], preferred_element_type=jnp.float32)
          + b_hh_ref[...])                                                # (B, 3H)
    r = jax.nn.sigmoid(gi[:, :H] + gh[:, :H])
    z = jax.nn.sigmoid(gi[:, H:2 * H] + gh[:, H:2 * H])
    n = jnp.tanh(gi[:, 2 * H:] + r * gh[:, 2 * H:])
    hnew_ref[...] = (1.0 - z) * n + z * h_prev                            # (B, H)


# --------------------------------------------------------------------------- #
# Kernel 2: H -> V projection, vocab-tiled, bf16 weight stream, f32 accumulation
# --------------------------------------------------------------------------- #
def vocab_projection_kernel(h_ref, w_out_ref, b_out_ref, logits_ref):
    h_bf16 = h_ref[...].astype(jnp.bfloat16)                              # (B, H)
    logits_ref[...] = (
        jnp.dot(h_bf16, w_out_ref[...], preferred_element_type=jnp.float32)
        + b_out_ref[...]
    )


def _round_up(x, m):
    return ((x + m - 1) // m) * m


def _vmem_limit(nbytes):
    # Generous but bounded: stay under v7x's 64 MiB physical VMEM.
    return int(min(max(nbytes, 16 << 20), 56 << 20))


def attn_decoder_forward(word_input, last_hidden, encoder_outputs, params, *, tile_n=512):
    """One decoder step.

    Returns (logits (B, V), hidden (1, B, H), attn_weights (B, 1, L)).
    attn_weights equals Attn('concat').forward(last_hidden[-1], encoder_outputs).
    """
    assert tile_n % 128 == 0
    B = word_input.shape[0]
    L = encoder_outputs.shape[1]
    H = params["w_hh"].shape[1]
    V = params["w_out"].shape[0]

    Bp = _round_up(B, 8)            # sublane alignment
    Hp = _round_up(H, 128)          # lane alignment -> aligned GRU gate slices
    Vp = _round_up(V, tile_n)

    f32 = jnp.float32

    # ---- activations (embedding gather stays in JAX glue) ----
    # TODO(synk): nn.Dropout on the embedding is eval-mode identity here; training-
    # mode dropout masking (and an in-kernel pl.Element row gather) not implemented.
    emb = jnp.take(params["embedding"], word_input, axis=0).astype(f32)       # (B, H)
    h_prev = last_hidden[-1].astype(f32)                                      # (B, H)
    enc = encoder_outputs.astype(f32)                                         # (B, L, H)

    emb_p = jnp.pad(emb, ((0, Bp - B), (0, Hp - H)))
    h_prev_p = jnp.pad(h_prev, ((0, Bp - B), (0, Hp - H)))
    enc_p = jnp.pad(enc, ((0, Bp - B), (0, 0), (0, Hp - H)))

    # ---- fold v into the concat-attention weights (exact: no tanh in score) ----
    w_attn, b_attn, v = params["w_attn"], params["b_attn"], params["v"]
    u_h = jnp.pad(v @ w_attn[:, :H], ((0, 0), (0, Hp - H)))                   # (1, Hp)
    u_e = jnp.pad(v @ w_attn[:, H:], ((0, 0), (0, Hp - H)))                   # (1, Hp)
    c = jnp.sum(v[0] * b_attn).reshape(1, 1)                                  # (1, 1)

    # ---- GRU weights: pre-transpose, pre-split (emb|ctx columns), per-gate pad ----
    def gates_T(w, col_lo, col_hi):
        blocks = []
        for g in range(3):
            blk = w[g * H:(g + 1) * H, col_lo:col_hi].T                       # (in, H)
            blk = jnp.pad(blk, ((0, Hp - blk.shape[0]), (0, Hp - H)))
            blocks.append(blk)
        return jnp.concatenate(blocks, axis=1)                                # (Hp, 3Hp)

    def gate_bias(b):
        return jnp.concatenate(
            [jnp.pad(b[g * H:(g + 1) * H], (0, Hp - H)) for g in range(3)]
        ).reshape(1, 3 * Hp)

    w_ih_emb_t = gates_T(params["w_ih"], 0, H)          # (Hp, 3Hp)
    w_ih_ctx_t = gates_T(params["w_ih"], H, 2 * H)      # (Hp, 3Hp)
    w_hh_t = gates_T(params["w_hh"], 0, H)              # (Hp, 3Hp)
    b_ih = gate_bias(params["b_ih"])
    b_hh = gate_bias(params["b_hh"])

    # ---- output projection: pre-transposed (H, V), padded, bf16, streamed over V ----
    w_out_bf16 = jnp.pad(params["w_out"].T, ((0, Hp - H), (0, Vp - V))).astype(jnp.bfloat16)
    b_out = jnp.pad(params["b_out"], (0, Vp - V)).reshape(1, Vp).astype(f32)

    vmem = pltpu.MemorySpace.VMEM
    smem = pltpu.MemorySpace.SMEM
    const2 = lambda j: (0, 0)
    const3 = lambda j: (0, 0, 0)

    # ---------------- call 1: attention + GRU state (grid of 1) ---------------- #
    state_resident = 4 * (2 * Bp * Hp + Bp * L * Hp + 2 * Hp + 1
                          + 3 * (Hp * 3 * Hp) + 2 * 3 * Hp
                          + Bp * Hp + Bp * L)
    state_limit = _vmem_limit(4 * state_resident + (4 << 20))

    state_spec = pltpu.PrefetchScalarGridSpec(
        num_scalar_prefetch=0,
        grid=(1,),
        in_specs=[
            pl.BlockSpec((Bp, Hp), const2, memory_space=vmem),                # emb
            pl.BlockSpec((Bp, Hp), const2, memory_space=vmem),                # h_prev
            pl.BlockSpec((Bp, L, Hp), const3, memory_space=vmem),             # enc
            pl.BlockSpec((1, Hp), const2, memory_space=vmem),                 # u_h
            pl.BlockSpec((1, Hp), const2, memory_space=vmem),                 # u_e
            pl.BlockSpec((1, 1), const2, memory_space=smem),                  # c
            pl.BlockSpec((Hp, 3 * Hp), const2, memory_space=vmem),            # w_ih_emb^T
            pl.BlockSpec((Hp, 3 * Hp), const2, memory_space=vmem),            # w_ih_ctx^T
            pl.BlockSpec((1, 3 * Hp), const2, memory_space=vmem),             # b_ih
            pl.BlockSpec((Hp, 3 * Hp), const2, memory_space=vmem),            # w_hh^T
            pl.BlockSpec((1, 3 * Hp), const2, memory_space=vmem),             # b_hh
        ],
        out_specs=(
            pl.BlockSpec((Bp, Hp), const2, memory_space=vmem),                # h_new
            pl.BlockSpec((Bp, L), const2, memory_space=vmem),                 # attn weights
        ),
    )

    hnew_p, attn_p = pl.pallas_call(
        attn_gru_state_kernel,
        out_shape=(
            jax.ShapeDtypeStruct((Bp, Hp), jnp.float32),
            jax.ShapeDtypeStruct((Bp, L), jnp.float32),
        ),
        grid_spec=state_spec,
        compiler_params=pltpu.CompilerParams(
            dimension_semantics=("arbitrary",),
            vmem_limit_bytes=state_limit,
        ),
    )(emb_p, h_prev_p, enc_p, u_h, u_e, c,
      w_ih_emb_t, w_ih_ctx_t, b_ih, w_hh_t, b_hh)

    # ---------------- call 2: vocab-tiled projection (parallel grid) ------------ #
    n_tiles = Vp // tile_n
    proj_resident = (2 * Hp * tile_n                    # bf16 w_out tile
                     + 4 * (Bp * Hp + tile_n + Bp * tile_n))
    proj_limit = _vmem_limit(3 * proj_resident + (4 << 20))

    proj_spec = pltpu.PrefetchScalarGridSpec(
        num_scalar_prefetch=0,
        grid=(n_tiles,),
        in_specs=[
            pl.BlockSpec((Bp, Hp), const2, memory_space=vmem),                # h_new
            pl.BlockSpec((Hp, tile_n), lambda j: (0, j), memory_space=vmem),  # w_out^T tile
            pl.BlockSpec((1, tile_n), lambda j: (0, j), memory_space=vmem),   # b_out tile
        ],
        out_specs=pl.BlockSpec((Bp, tile_n), lambda j: (0, j), memory_space=vmem),
    )

    logits_p = pl.pallas_call(
        vocab_projection_kernel,
        out_shape=jax.ShapeDtypeStruct((Bp, Vp), jnp.float32),
        grid_spec=proj_spec,
        compiler_params=pltpu.CompilerParams(
            # No carried state across vocab tiles -> safe to shard across
            # TensorCores (2x on v7x for the dominant weight-streaming phase).
            dimension_semantics=("parallel",),
            vmem_limit_bytes=proj_limit,
        ),
    )(hnew_p, w_out_bf16, b_out)

    logits = logits_p[:B, :V]
    hidden = hnew_p[:B, :H][None, :, :]
    attn_weights = attn_p[:B, :][:, None, :]
    return logits, hidden, attn_weights


# --------------------------------------------------------------------------- #
# Pure-JAX reference (mirror of the PyTorch forward, eval mode)
# --------------------------------------------------------------------------- #
def reference_forward(word_input, last_hidden, encoder_outputs, params):
    hi = jax.lax.Precision.HIGHEST
    emb = jnp.take(params["embedding"], word_input, axis=0)
    h = last_hidden[-1]
    B, L, H = encoder_outputs.shape
    W, b, v = params["w_attn"], params["b_attn"], params["v"]
    hid_rep = jnp.broadcast_to(h[:, None, :], (B, L, H))
    cat = jnp.concatenate([hid_rep, encoder_outputs], axis=-1)                # (B, L, 2H)
    lin = jnp.einsum("blk,hk->blh", cat, W, precision=hi) + b                 # Linear(2H->H)
    energy = jnp.einsum("blh,h->bl", lin, v[0], precision=hi)
    attn = jax.nn.softmax(energy, axis=1)
    context = jnp.einsum("bl,blh->bh", attn, encoder_outputs, precision=hi)
    rnn_in = jax.nn.relu(jnp.concatenate([emb, context], axis=1))
    gi = jnp.dot(rnn_in, params["w_ih"].T, precision=hi) + params["b_ih"]
    gh = jnp.dot(h, params["w_hh"].T, precision=hi) + params["b_hh"]
    r = jax.nn.sigmoid(gi[:, :H] + gh[:, :H])
    z = jax.nn.sigmoid(gi[:, H:2 * H] + gh[:, H:2 * H])
    n = jnp.tanh(gi[:, 2 * H:] + r * gh[:, 2 * H:])
    h_new = (1.0 - z) * n + z * h
    logits = jnp.dot(h_new, params["w_out"].T, precision=hi) + params["b_out"]
    return logits, h_new[None], attn[:, None, :]


def init_params(key, hidden_size, vocab_size):
    H, V = hidden_size, vocab_size
    ks = jax.random.split(key, 10)
    s = 0.1
    return {
        "embedding": s * jax.random.normal(ks[0], (V, H), jnp.float32),
        # Attn('concat', H): nn.Linear(2H -> H) and v : (1, H)
        "w_attn": s * jax.random.normal(ks[1], (H, 2 * H), jnp.float32),
        "b_attn": s * jax.random.normal(ks[2], (H,), jnp.float32),
        "v": s * jax.random.normal(ks[3], (1, H), jnp.float32),
        # GRU(input=2H, hidden=H, num_layers=1), gate order (r, z, n)
        "w_ih": s * jax.random.normal(ks[4], (3 * H, 2 * H), jnp.float32),
        "b_ih": s * jax.random.normal(ks[5], (3 * H,), jnp.float32),
        "w_hh": s * jax.random.normal(ks[6], (3 * H, H), jnp.float32),
        "b_hh": s * jax.random.normal(ks[7], (3 * H,), jnp.float32),
        # out: nn.Linear(H -> V)
        "w_out": s * jax.random.normal(ks[8], (V, H), jnp.float32),
        "b_out": s * jax.random.normal(ks[9], (V,), jnp.float32),
    }


if __name__ == "__main__":
    # Small, deliberately unaligned logical shapes; wrapper pads B->8, H->128,
    # V->multiple of TILE_N (=512 default => 2 grid steps over the vocab axis).
    B, H, L, V = 2, 32, 8, 1000
    num_layers = 1

    key = jax.random.PRNGKey(0)
    kp, k1, k2, k3 = jax.random.split(key, 4)

    params = init_params(kp, H, V)
    word_input = jax.random.randint(k1, (B,), 0, V, dtype=jnp.int32)          # (B,)
    last_hidden = jax.random.normal(k2, (num_layers, B, H), jnp.float32)      # (1, B, H)
    encoder_outputs = jax.random.normal(k3, (B, L, H), jnp.float32)           # (B, L, H)

    fwd = jax.jit(attn_decoder_forward)
    logits, hidden, attn_w = fwd(word_input, last_hidden, encoder_outputs, params)
    jax.block_until_ready((logits, hidden, attn_w))

    ref_logits, ref_hidden, ref_attn = reference_forward(
        word_input, last_hidden, encoder_outputs, params)

    assert logits.shape == (B, V)
    assert hidden.shape == (num_layers, B, H)
    assert attn_w.shape == (B, 1, L)                 # == Attn('concat').forward output
    assert bool(jnp.all(jnp.isfinite(logits))) and bool(jnp.all(jnp.isfinite(hidden)))
    # Attention / hidden path is pure f32 -> tight tolerances.
    assert bool(jnp.allclose(attn_w, ref_attn, atol=5e-3, rtol=1e-2))
    assert bool(jnp.allclose(hidden, ref_hidden, atol=5e-3, rtol=1e-2))
    # Logits use a bf16 weight stream (f32 accumulation) -> loosened tolerance.
    assert bool(jnp.allclose(logits, ref_logits, atol=2e-2, rtol=2e-2))
    print("KERNEL_OK")
</pallas_src>

<mosaic_0001>
module attributes {stable_mosaic.version = 11 : i64} {
  func.func @attn_gru_state_kernel(%arg0: i32, %arg1: memref<8x128xf32, #tpu.memory_space<vmem>>, %arg2: memref<8x128xf32, #tpu.memory_space<vmem>>, %arg3: memref<8x8x128xf32, #tpu.memory_space<vmem>>, %arg4: memref<1x128xf32, #tpu.memory_space<vmem>>, %arg5: memref<1x128xf32, #tpu.memory_space<vmem>>, %arg6: memref<1x1xf32, #tpu.memory_space<smem>>, %arg7: memref<128x384xf32, #tpu.memory_space<vmem>>, %arg8: memref<128x384xf32, #tpu.memory_space<vmem>>, %arg9: memref<1x384xf32, #tpu.memory_space<vmem>>, %arg10: memref<128x384xf32, #tpu.memory_space<vmem>>, %arg11: memref<1x384xf32, #tpu.memory_space<vmem>>, %arg12: memref<8x128xf32, #tpu.memory_space<vmem>>, %arg13: memref<8x8xf32, #tpu.memory_space<vmem>>) attributes {dimension_semantics = [#tpu.dimension_semantics<arbitrary>], iteration_bounds = array<i64: 1>, scalar_prefetch = 0 : i64, scratch_operands = 0 : i64, tpu.core_type = #tpu.core_type<tc>, window_params = [{pipeline_mode = #tpu.pipeline_mode<synchronous>, transform_indices = @transform_0, window_bounds = array<i64: 8, 128>}, {pipeline_mode = #tpu.pipeline_mode<synchronous>, transform_indices = @transform_1, window_bounds = array<i64: 8, 128>}, {pipeline_mode = #tpu.pipeline_mode<synchronous>, transform_indices = @transform_2, window_bounds = array<i64: 8, 8, 128>}, {pipeline_mode = #tpu.pipeline_mode<synchronous>, transform_indices = @transform_3, window_bounds = array<i64: 1, 128>}, {pipeline_mode = #tpu.pipeline_mode<synchronous>, transform_indices = @transform_4, window_bounds = array<i64: 1, 128>}, {transform_indices = @transform_5, window_bounds = array<i64: 1, 1>}, {pipeline_mode = #tpu.pipeline_mode<synchronous>, transform_indices = @transform_6, window_bounds = array<i64: 128, 384>}, {pipeline_mode = #tpu.pipeline_mode<synchronous>, transform_indices = @transform_7, window_bounds = array<i64: 128, 384>}, {pipeline_mode = #tpu.pipeline_mode<synchronous>, transform_indices = @transform_8, window_bounds = array<i64: 1, 384>}, {pipeline_mode = #tpu.pipeline_mode<synchronous>, transform_indices = @transform_9, window_bounds = array<i64: 128, 384>}, {pipeline_mode = #tpu.pipeline_mode<synchronous>, transform_indices = @transform_10, window_bounds = array<i64: 1, 384>}, {pipeline_mode = #tpu.pipeline_mode<synchronous>, transform_indices = @transform_11, window_bounds = array<i64: 8, 128>}, {pipeline_mode = #tpu.pipeline_mode<synchronous>, transform_indices = @transform_12, window_bounds = array<i64: 8, 8>}]} {
    %c0 = arith.constant 0 : index
    %c0_0 = arith.constant 0 : index
    %0 = vector.load %arg1[%c0, %c0_0] : memref<8x128xf32, #tpu.memory_space<vmem>>, vector<8x128xf32>
    %c0_1 = arith.constant 0 : index
    %c0_2 = arith.constant 0 : index
    %1 = vector.load %arg2[%c0_1, %c0_2] : memref<8x128xf32, #tpu.memory_space<vmem>>, vector<8x128xf32>
    %c0_3 = arith.constant 0 : index
    %c0_4 = arith.constant 0 : index
    %c0_5 = arith.constant 0 : index
    %2 = vector.load %arg3[%c0_3, %c0_4, %c0_5] : memref<8x8x128xf32, #tpu.memory_space<vmem>>, vector<8x8x128xf32>
    %c0_6 = arith.constant 0 : index
    %c0_7 = arith.constant 0 : index
    %3 = vector.load %arg4[%c0_6, %c0_7] : memref<1x128xf32, #tpu.memory_space<vmem>>, vector<1x128xf32>
    %4 = vector.broadcast %3 : vector<1x128xf32> to vector<8x128xf32>
    %5 = arith.mulf %1, %4 : vector<8x128xf32>
    %cst = arith.constant dense<0.000000e+00> : vector<8xf32>
    %6 = vector.multi_reduction <add>, %5, %cst [1] : vector<8x128xf32> to vector<8xf32>
    %7 = vector.shape_cast %6 : vector<8xf32> to vector<8x1xf32>
    %c0_8 = arith.constant 0 : index
    %c0_9 = arith.constant 0 : index
    %8 = vector.load %arg5[%c0_8, %c0_9] : memref<1x128xf32, #tpu.memory_space<vmem>>, vector<1x128xf32>
    %9 = vector.shape_cast %8 : vector<1x128xf32> to vector<1x1x128xf32>
    %10 = vector.broadcast %9 : vector<1x1x128xf32> to vector<8x8x128xf32>
    %11 = arith.mulf %2, %10 : vector<8x8x128xf32>
    %cst_10 = arith.constant dense<0.000000e+00> : vector<8x8xf32>
    %12 = vector.multi_reduction <add>, %11, %cst_10 [2] : vector<8x8x128xf32> to vector<8x8xf32>
    %13 = vector.broadcast %7 : vector<8x1xf32> to vector<8x8xf32>
    %14 = arith.addf %12, %13 : vector<8x8xf32>
    %c0_11 = arith.constant 0 : index
    %c0_12 = arith.constant 0 : index
    %15 = memref.load %arg6[%c0_11, %c0_12] : memref<1x1xf32, #tpu.memory_space<smem>>
    %16 = vector.broadcast %15 : f32 to vector<8x8xf32>
    %17 = arith.addf %14, %16 : vector<8x8xf32>
    %cst_13 = arith.constant dense<0xFF800000> : vector<8xf32>
    %18 = vector.multi_reduction <maximumf>, %17, %cst_13 [1] : vector<8x8xf32> to vector<8xf32>
    %19 = vector.shape_cast %18 : vector<8xf32> to vector<8x1xf32>
    %20 = vector.broadcast %19 : vector<8x1xf32> to vector<8x8xf32>
    %21 = arith.subf %17, %20 : vector<8x8xf32>
    %22 = math.exp %21 : vector<8x8xf32>
    %cst_14 = arith.constant dense<0.000000e+00> : vector<8xf32>
    %23 = vector.multi_reduction <add>, %22, %cst_14 [1] : vector<8x8xf32> to vector<8xf32>
    %24 = vector.shape_cast %23 : vector<8xf32> to vector<8x1xf32>
    %25 = vector.broadcast %24 : vector<8x1xf32> to vector<8x8xf32>
    %26 = arith.divf %22, %25 : vector<8x8xf32>
    %c0_15 = arith.constant 0 : index
    %c0_16 = arith.constant 0 : index
    %27 = vector.load %arg13[%c0_15, %c0_16] : memref<8x8xf32, #tpu.memory_space<vmem>>, vector<8x8xf32>
    tpu.vector_store %arg13[%c0_15, %c0_16], %26 {strides = array<i32>} : memref<8x8xf32, #tpu.memory_space<vmem>>, vector<8x8xf32>,
    %28 = vector.shape_cast %26 : vector<8x8xf32> to vector<8x8x1xf32>
    %29 = vector.broadcast %28 : vector<8x8x1xf32> to vector<8x8x128xf32>
    %30 = arith.mulf %29, %2 : vector<8x8x128xf32>
    %cst_17 = arith.constant dense<0.000000e+00> : vector<8x128xf32>
    %31 = vector.multi_reduction <add>, %30, %cst_17 [1] : vector<8x8x128xf32> to vector<8x128xf32>
    %cst_18 = arith.constant 0.000000e+00 : f32
    %32 = vector.broadcast %cst_18 : f32 to vector<8x128xf32>
    %33 = arith.maximumf %0, %32 : vector<8x128xf32>
    %cst_19 = arith.constant 0.000000e+00 : f32
    %34 = vector.broadcast %cst_19 : f32 to vector<8x128xf32>
    %35 = arith.maximumf %31, %34 : vector<8x128xf32>
    %c0_20 = arith.constant 0 : index
    %c0_21 = arith.constant 0 : index
    %36 = vector.load %arg7[%c0_20, %c0_21] : memref<128x384xf32, #tpu.memory_space<vmem>>, vector<128x384xf32>
    %cst_22 = arith.constant dense<0.000000e+00> : vector<8x384xf32>
    %37 = tpu.matmul %33, %36, %cst_22 {dimension_numbers = #tpu.dot_dimension_numbers<[1], [0], [0], [1], [0, 0, 1, 1], [], []>} : vector<8x128xf32>, vector<128x384xf32>, vector<8x384xf32> -> vector<8x384xf32>
    %c0_23 = arith.constant 0 : index
    %c0_24 = arith.constant 0 : index
    %38 = vector.load %arg8[%c0_23, %c0_24] : memref<128x384xf32, #tpu.memory_space<vmem>>, vector<128x384xf32>
    %cst_25 = arith.constant dense<0.000000e+00> : vector<8x384xf32>
    %39 = tpu.matmul %35, %38, %cst_25 {dimension_numbers = #tpu.dot_dimension_numbers<[1], [0], [0], [1], [0, 0, 1, 1], [], []>} : vector<8x128xf32>, vector<128x384xf32>, vector<8x384xf32> -> vector<8x384xf32>
    %40 = arith.addf %37, %39 : vector<8x384xf32>
    %c0_26 = arith.constant 0 : index
    %c0_27 = arith.constant 0 : index
    %41 = vector.load %arg9[%c0_26, %c0_27] : memref<1x384xf32, #tpu.memory_space<vmem>>, vector<1x384xf32>
    %42 = vector.broadcast %41 : vector<1x384xf32> to vector<8x384xf32>
    %43 = arith.addf %40, %42 : vector<8x384xf32>
    %c0_28 = arith.constant 0 : index
    %c0_29 = arith.constant 0 : index
    %44 = vector.load %arg10[%c0_28, %c0_29] : memref<128x384xf32, #tpu.memory_space<vmem>>, vector<128x384xf32>
    %cst_30 = arith.constant dense<0.000000e+00> : vector<8x384xf32>
    %45 = tpu.matmul %1, %44, %cst_30 {dimension_numbers = #tpu.dot_dimension_numbers<[1], [0], [0], [1], [0, 0, 1, 1], [], []>} : vector<8x128xf32>, vector<128x384xf32>, vector<8x384xf32> -> vector<8x384xf32>
    %c0_31 = arith.constant 0 : index
    %c0_32 = arith.constant 0 : index
    %46 = vector.load %arg11[%c0_31, %c0_32] : memref<1x384xf32, #tpu.memory_space<vmem>>, vector<1x384xf32>
    %47 = vector.broadcast %46 : vector<1x384xf32> to vector<8x384xf32>
    %48 = arith.addf %45, %47 : vector<8x384xf32>
    %49 = vector.extract_strided_slice %43 {offsets = [0, 0], sizes = [8, 128], strides = [1, 1]} : vector<8x384xf32> to vector<8x128xf32>
    %50 = vector.extract_strided_slice %48 {offsets = [0, 0], sizes = [8, 128], strides = [1, 1]} : vector<8x384xf32> to vector<8x128xf32>
    %51 = arith.addf %49, %50 : vector<8x128xf32>
    %52 = arith.negf %51 : vector<8x128xf32>
    %53 = math.exp %52 : vector<8x128xf32>
    %cst_33 = arith.constant 1.000000e+00 : f32
    %54 = vector.broadcast %cst_33 : f32 to vector<8x128xf32>
    %55 = arith.addf %54, %53 : vector<8x128xf32>
    %56 = arith.divf %54, %55 : vector<8x128xf32>
    %57 = vector.extract_strided_slice %43 {offsets = [0, 128], sizes = [8, 128], strides = [1, 1]} : vector<8x384xf32> to vector<8x128xf32>
    %58 = vector.extract_strided_slice %48 {offsets = [0, 128], sizes = [8, 128], strides = [1, 1]} : vector<8x384xf32> to vector<8x128xf32>
    %59 = arith.addf %57, %58 : vector<8x128xf32>
    %60 = arith.negf %59 : vector<8x128xf32>
    %61 = math.exp %60 : vector<8x128xf32>
    %cst_34 = arith.constant 1.000000e+00 : f32
    %62 = vector.broadcast %cst_34 : f32 to vector<8x128xf32>
    %63 = arith.addf %62, %61 : vector<8x128xf32>
    %64 = arith.divf %62, %63 : vector<8x128xf32>
    %65 = vector.extract_strided_slice %43 {offsets = [0, 256], sizes = [8, 128], strides = [1, 1]} : vector<8x384xf32> to vector<8x128xf32>
    %66 = vector.extract_strided_slice %48 {offsets = [0, 256], sizes = [8, 128], strides = [1, 1]} : vector<8x384xf32> to vector<8x128xf32>
    %67 = arith.mulf %56, %66 : vector<8x128xf32>
    %68 = arith.addf %65, %67 : vector<8x128xf32>
    %69 = math.tanh %68 : vector<8x128xf32>
    %cst_35 = arith.constant 1.000000e+00 : f32
    %70 = vector.broadcast %cst_35 : f32 to vector<8x128xf32>
    %71 = arith.subf %70, %64 : vector<8x128xf32>
    %72 = arith.mulf %71, %69 : vector<8x128xf32>
    %73 = arith.mulf %64, %1 : vector<8x128xf32>
    %74 = arith.addf %72, %73 : vector<8x128xf32>
    %c0_36 = arith.constant 0 : index
    %c0_37 = arith.constant 0 : index
    %75 = vector.load %arg12[%c0_36, %c0_37] : memref<8x128xf32, #tpu.memory_space<vmem>>, vector<8x128xf32>
    tpu.vector_store %arg12[%c0_36, %c0_37], %74 {strides = array<i32>} : memref<8x128xf32, #tpu.memory_space<vmem>>, vector<8x128xf32>,
    return
  }
  func.func @transform_0(%arg0: i32) -> (i32, i32) {
    %c0_i32 = arith.constant 0 : i32
    %c0_i32_0 = arith.constant 0 : i32
    %c0_i32_1 = arith.constant 0 : i32
    return %c0_i32, %c0_i32_0 : i32, i32
  }
  func.func @transform_1(%arg0: i32) -> (i32, i32) {
    %c0_i32 = arith.constant 0 : i32
    %c0_i32_0 = arith.constant 0 : i32
    %c0_i32_1 = arith.constant 0 : i32
    return %c0_i32, %c0_i32_0 : i32, i32
  }
  func.func @transform_2(%arg0: i32) -> (i32, i32, i32) {
    %c0_i32 = arith.constant 0 : i32
    %c0_i32_0 = arith.constant 0 : i32
    %c0_i32_1 = arith.constant 0 : i32
    %c0_i32_2 = arith.constant 0 : i32
    return %c0_i32, %c0_i32_0, %c0_i32_1 : i32, i32, i32
  }
  func.func @transform_3(%arg0: i32) -> (i32, i32) {
    %c0_i32 = arith.constant 0 : i32
    %c0_i32_0 = arith.constant 0 : i32
    %c0_i32_1 = arith.constant 0 : i32
    return %c0_i32, %c0_i32_0 : i32, i32
  }
  func.func @transform_4(%arg0: i32) -> (i32, i32) {
    %c0_i32 = arith.constant 0 : i32
    %c0_i32_0 = arith.constant 0 : i32
    %c0_i32_1 = arith.constant 0 : i32
    return %c0_i32, %c0_i32_0 : i32, i32
  }
  func.func @transform_5(%arg0: i32) -> (i32, i32) {
    %c0_i32 = arith.constant 0 : i32
    %c0_i32_0 = arith.constant 0 : i32
    %c0_i32_1 = arith.constant 0 : i32
    return %c0_i32, %c0_i32_0 : i32, i32
  }
  func.func @transform_6(%arg0: i32) -> (i32, i32) {
    %c0_i32 = arith.constant 0 : i32
    %c0_i32_0 = arith.constant 0 : i32
    %c0_i32_1 = arith.constant 0 : i32
    return %c0_i32, %c0_i32_0 : i32, i32
  }
  func.func @transform_7(%arg0: i32) -> (i32, i32) {
    %c0_i32 = arith.constant 0 : i32
    %c0_i32_0 = arith.constant 0 : i32
    %c0_i32_1 = arith.constant 0 : i32
    return %c0_i32, %c0_i32_0 : i32, i32
  }
  func.func @transform_8(%arg0: i32) -> (i32, i32) {
    %c0_i32 = arith.constant 0 : i32
    %c0_i32_0 = arith.constant 0 : i32
    %c0_i32_1 = arith.constant 0 : i32
    return %c0_i32, %c0_i32_0 : i32, i32
  }
  func.func @transform_9(%arg0: i32) -> (i32, i32) {
    %c0_i32 = arith.constant 0 : i32
    %c0_i32_0 = arith.constant 0 : i32
    %c0_i32_1 = arith.constant 0 : i32
    return %c0_i32, %c0_i32_0 : i32, i32
  }
  func.func @transform_10(%arg0: i32) -> (i32, i32) {
    %c0_i32 = arith.constant 0 : i32
    %c0_i32_0 = arith.constant 0 : i32
    %c0_i32_1 = arith.constant 0 : i32
    return %c0_i32, %c0_i32_0 : i32, i32
  }
  func.func @transform_11(%arg0: i32) -> (i32, i32) {
    %c0_i32 = arith.constant 0 : i32
    %c0_i32_0 = arith.constant 0 : i32
    %c0_i32_1 = arith.constant 0 : i32
    return %c0_i32, %c0_i32_0 : i32, i32
  }
  func.func @transform_12(%arg0: i32) -> (i32, i32) {
    %c0_i32 = arith.constant 0 : i32
    %c0_i32_0 = arith.constant 0 : i32
    %c0_i32_1 = arith.constant 0 : i32
    return %c0_i32, %c0_i32_0 : i32, i32
  }
}

module attributes {stable_mosaic.version = 11 : i64} {
  func.func @vocab_projection_kernel(%arg0: i32, %arg1: memref<8x128xf32, #tpu.memory_space<vmem>>, %arg2: memref<128x512xbf16, #tpu.memory_space<vmem>>, %arg3: memref<1x512xf32, #tpu.memory_space<vmem>>, %arg4: memref<8x512xf32, #tpu.memory_space<vmem>>) attributes {dimension_semantics = [#tpu.dimension_semantics<parallel>], iteration_bounds = array<i64: 2>, scalar_prefetch = 0 : i64, scratch_operands = 0 : i64, tpu.core_type = #tpu.core_type<tc>, window_params = [{pipeline_mode = #tpu.pipeline_mode<synchronous>, transform_indices = @transform_0, window_bounds = array<i64: 8, 128>}, {transform_indices = @transform_1, window_bounds = array<i64: 128, 512>}, {transform_indices = @transform_2, window_bounds = array<i64: 1, 512>}, {transform_indices = @transform_3, window_bounds = array<i64: 8, 512>}]} {
    %c0 = arith.constant 0 : index
    %c0_0 = arith.constant 0 : index
    %0 = vector.load %arg1[%c0, %c0_0] : memref<8x128xf32, #tpu.memory_space<vmem>>, vector<8x128xf32>
    %1 = arith.truncf %0 : vector<8x128xf32> to vector<8x128xbf16>
    %c0_1 = arith.constant 0 : index
    %c0_2 = arith.constant 0 : index
    %2 = vector.load %arg2[%c0_1, %c0_2] : memref<128x512xbf16, #tpu.memory_space<vmem>>, vector<128x512xbf16>
    %cst = arith.constant dense<0.000000e+00> : vector<8x512xf32>
    %3 = tpu.matmul %1, %2, %cst {dimension_numbers = #tpu.dot_dimension_numbers<[1], [0], [0], [1], [0, 0, 1, 1], [], []>} : vector<8x128xbf16>, vector<128x512xbf16>, vector<8x512xf32> -> vector<8x512xf32>
    %c0_3 = arith.constant 0 : index
    %c0_4 = arith.constant 0 : index
    %4 = vector.load %arg3[%c0_3, %c0_4] : memref<1x512xf32, #tpu.memory_space<vmem>>, vector<1x512xf32>
    %5 = vector.broadcast %4 : vector<1x512xf32> to vector<8x512xf32>
    %6 = arith.addf %3, %5 : vector<8x512xf32>
    %c0_5 = arith.constant 0 : index
    %c0_6 = arith.constant 0 : index
    %7 = vector.load %arg4[%c0_5, %c0_6] : memref<8x512xf32, #tpu.memory_space<vmem>>, vector<8x512xf32>
    tpu.vector_store %arg4[%c0_5, %c0_6], %6 {strides = array<i32>} : memref<8x512xf32, #tpu.memory_space<vmem>>, vector<8x512xf32>,
    return
  }
  func.func @transform_0(%arg0: i32) -> (i32, i32) {
    %c0_i32 = arith.constant 0 : i32
    %c0_i32_0 = arith.constant 0 : i32
    %c0_i32_1 = arith.constant 0 : i32
    return %c0_i32, %c0_i32_0 : i32, i32
  }
  func.func @transform_1(%arg0: i32) -> (i32, i32) {
    %c0_i32 = arith.constant 0 : i32
    %c0_i32_0 = arith.constant 0 : i32
    return %c0_i32, %arg0 : i32, i32
  }
  func.func @transform_2(%arg0: i32) -> (i32, i32) {
    %c0_i32 = arith.constant 0 : i32
    %c0_i32_0 = arith.constant 0 : i32
    return %c0_i32, %arg0 : i32, i32
  }
  func.func @transform_3(%arg0: i32) -> (i32, i32) {
    %c0_i32 = arith.constant 0 : i32
    %c0_i32_0 = arith.constant 0 : i32
    return %c0_i32, %arg0 : i32, i32
  }
}

</mosaic_0001>

<bundles_post_ra>
// kernel: attn_decoder_forward.3
= control target key start
LH: loop header
LB: loop body
LE: loop exit
PB: predicated region body
PF: predicated region fallthrough
CT: control target
= control target key end

     0   :  { %s813_s12 = smov 0   ;;  %s815_s13 = smov 0   ;;  %s973_s0 = inlined_call_operand.vmem [shape: f32[8,128], index: 0, kind: input, shape index: {}]   ;;  %s974_s1 = inlined_call_operand.vmem [shape: bf16[128,1024], index: 1, kind: input, shape index: {}]   ;;  %s975_s2 = inlined_call_operand.vmem [shape: f32[1,1024], index: 2, kind: input, shape index: {}]   ;;  %s976_s3 = inlined_call_operand.vmem [shape: f32[8,1024], index: 3, kind: output, shape index: {}]  }
   0x1   :  { %s817_s14 = smov 0  }
   0x2 LB: > { %s648_s15 = sadd.s32 4294967295, %s790_s14   ;;  %s830_s16 = sadd.s32 1, %s790_s14   ;;  %s790_s14 = sphi %s817_s14, %s979_s14   ;;  %s786_s13 = sphi %s815_s13, %s978_s13   ;;  %s782_s12 = sphi %s813_s12, %s977_s12  }
   0x3   : > { %s38_s17 = ssub.s32 %s790_s14, %s830_s16  ;;  %s41_s18 = sadd.s32 1, %s786_s13 }
   0x4   : > { %p39_p0 = scmp.eq.s32.totalorder %s38_s17, 0  ;;  %p48_p1 = scmp.ne.s32.totalorder %s786_s13, %s782_s12 }
   0x5   : > { %p49_p2 = scmp.eq.s32.totalorder %s790_s14, 0  ;;  %p651_p4 = scmp.ge.s32.totalorder %s790_s14, 2 }
   0x6   : > { %s839_s19 = scalar_select %p39_p0, %s786_s13, %s41_s18  }
   0x7   : > { %p50_p3 = por %p49_p2, %p48_p1  ;;  %129 = sbr.rel (%p651_p4) target bundleno = 34 (0x22), region = 20 }
   0xe   : > { %132 = sbr.rel (!%p50_p3) target bundleno = 34 (0x22), region = 24  ;;  %s134_s20 = sand.u32 (%p50_p3), 1, %s786_s13  }
   0xf   : > { %s694_s21 = sshll.u32 (%p50_p3), %s790_s14, 4  ;;  %s652_s22 = sshll.u32 (%p50_p3), %s134_s20, 8 }
  0x10   : > { %s847_s25 = scalar_lea.vmem (%p50_p3), %s974_s1, %s694_s21  ;;  %s852_s26 = scalar_lea.vmem (%p50_p3), [#allocation2], %s652_s22 }
  0x11   : > { %v152_v0 = vld [vmem:[%s847_s25] sm:$0xff] (%p50_p3)  ;;  %v154_v1 = vld [vmem:[%s847_s25 + $0x8] sm:$0xff] (%p50_p3) }
  0x12   : > { %v156_v2 = vld [vmem:[%s847_s25 + $0x20] sm:$0xff] (%p50_p3)  ;;  %153 = vst [vmem:[%s852_s26] sm:$0xff] (%p50_p3), %v152_v0  ;;  %155 = vst [vmem:[%s852_s26 + $0x8] sm:$0xff] (%p50_p3), %v154_v1  ;;  %v158_v3 = vld [vmem:[%s847_s25 + $0x28] sm:$0xff] (%p50_p3) }
  0x13   : > { %157 = vst [vmem:[%s852_s26 + $0x10] sm:$0xff] (%p50_p3), %v156_v2  ;;  %v160_v4 = vld [vmem:[%s847_s25 + $0x40] sm:$0xff] (%p50_p3)  ;;  %v162_v5 = vld [vmem:[%s847_s25 + $0x48] sm:$0xff] (%p50_p3)  ;;  %159 = vst [vmem:[%s852_s26 + $0x18] sm:$0xff] (%p50_p3), %v158_v3 }
  0x14   : > { %161 = vst [vmem:[%s852_s26 + $0x20] sm:$0xff] (%p50_p3), %v160_v4  ;;  %163 = vst [vmem:[%s852_s26 + $0x28] sm:$0xff] (%p50_p3), %v162_v5  ;;  %v164_v6 = vld [vmem:[%s847_s25 + $0x60] sm:$0xff] (%p50_p3)  ;;  %v166_v7 = vld [vmem:[%s847_s25 + $0x68] sm:$0xff] (%p50_p3) }
  0x15   : > { %v168_v8 = vld [vmem:[%s847_s25 + $0x80] sm:$0xff]  ;;  %165 = vst [vmem:[%s852_s26 + $0x30] sm:$0xff] %v164_v6  ;;  %167 = vst [vmem:[%s852_s26 + $0x38] sm:$0xff] %v166_v7  ;;  %v170_v9 = vld [vmem:[%s847_s25 + $0x88] sm:$0xff] }
  0x16   : > { %169 = vst [vmem:[%s852_s26 + $0x40] sm:$0xff] %v168_v8  ;;  %v172_v10 = vld [vmem:[%s847_s25 + $0xa0] sm:$0xff]  ;;  %v174_v11 = vld [vmem:[%s847_s25 + $0xa8] sm:$0xff]  ;;  %171 = vst [vmem:[%s852_s26 + $0x48] sm:$0xff] %v170_v9 }
  0x17   : > { %173 = vst [vmem:[%s852_s26 + $0x50] sm:$0xff] %v172_v10  ;;  %175 = vst [vmem:[%s852_s26 + $0x58] sm:$0xff] %v174_v11  ;;  %v176_v12 = vld [vmem:[%s847_s25 + $0xc0] sm:$0xff]  ;;  %v178_v13 = vld [vmem:[%s847_s25 + $0xc8] sm:$0xff] }
  0x18   : > { %v180_v14 = vld [vmem:[%s847_s25 + $0xe0] sm:$0xff]  ;;  %177 = vst [vmem:[%s852_s26 + $0x60] sm:$0xff] %v176_v12  ;;  %179 = vst [vmem:[%s852_s26 + $0x68] sm:$0xff] %v178_v13  ;;  %v182_v15 = vld [vmem:[%s847_s25 + $0xe8] sm:$0xff] }
  0x19   : > { %181 = vst [vmem:[%s852_s26 + $0x70] sm:$0xff] %v180_v14  ;;  %v184_v16 = vld [vmem:[%s847_s25 + $0x100] sm:$0xff]  ;;  %v186_v17 = vld [vmem:[%s847_s25 + $0x108] sm:$0xff]  ;;  %183 = vst [vmem:[%s852_s26 + $0x78] sm:$0xff] %v182_v15 }
  0x1a   : > { %185 = vst [vmem:[%s852_s26 + $0x80] sm:$0xff] %v184_v16  ;;  %187 = vst [vmem:[%s852_s26 + $0x88] sm:$0xff] %v186_v17  ;;  %v188_v18 = vld [vmem:[%s847_s25 + $0x120] sm:$0xff]  ;;  %v190_v19 = vld [vmem:[%s847_s25 + $0x128] sm:$0xff] }
  0x1b   : > { %v192_v20 = vld [vmem:[%s847_s25 + $0x140] sm:$0xff]  ;;  %189 = vst [vmem:[%s852_s26 + $0x90] sm:$0xff] %v188_v18  ;;  %191 = vst [vmem:[%s852_s26 + $0x98] sm:$0xff] %v190_v19  ;;  %v194_v21 = vld [vmem:[%s847_s25 + $0x148] sm:$0xff] }
  0x1c   : > { %193 = vst [vmem:[%s852_s26 + $0xa0] sm:$0xff] %v192_v20  ;;  %v196_v22 = vld [vmem:[%s847_s25 + $0x160] sm:$0xff]  ;;  %v198_v23 = vld [vmem:[%s847_s25 + $0x168] sm:$0xff]  ;;  %195 = vst [vmem:[%s852_s26 + $0xa8] sm:$0xff] %v194_v21 }
  0x1d   : > { %197 = vst [vmem:[%s852_s26 + $0xb0] sm:$0xff] %v196_v22  ;;  %199 = vst [vmem:[%s852_s26 + $0xb8] sm:$0xff] %v198_v23  ;;  %v200_v24 = vld [vmem:[%s847_s25 + $0x180] sm:$0xff]  ;;  %v202_v25 = vld [vmem:[%s847_s25 + $0x188] sm:$0xff] }
  0x1e   : > { %v204_v26 = vld [vmem:[%s847_s25 + $0x1a0] sm:$0xff]  ;;  %201 = vst [vmem:[%s852_s26 + $0xc0] sm:$0xff] %v200_v24  ;;  %203 = vst [vmem:[%s852_s26 + $0xc8] sm:$0xff] %v202_v25  ;;  %v206_v27 = vld [vmem:[%s847_s25 + $0x1a8] sm:$0xff] }
  0x1f   : > { %205 = vst [vmem:[%s852_s26 + $0xd0] sm:$0xff] %v204_v26  ;;  %v208_v28 = vld [vmem:[%s847_s25 + $0x1c0] sm:$0xff]  ;;  %v210_v29 = vld [vmem:[%s847_s25 + $0x1c8] sm:$0xff]  ;;  %207 = vst [vmem:[%s852_s26 + $0xd8] sm:$0xff] %v206_v27 }
  0x20   : > { %209 = vst [vmem:[%s852_s26 + $0xe0] sm:$0xff] %v208_v28  ;;  %211 = vst [vmem:[%s852_s26 + $0xe8] sm:$0xff] %v210_v29  ;;  %v212_v30 = vld [vmem:[%s847_s25 + $0x1e0] sm:$0xff]  ;;  %v214_v31 = vld [vmem:[%s847_s25 + $0x1e8] sm:$0xff] }
  0x21   : > { %213 = vst [vmem:[%s852_s26 + $0xf0] sm:$0xff] %v212_v30  ;;  %215 = vst [vmem:[%s852_s26 + $0xf8] sm:$0xff] %v214_v31 }
  0x22 PF: > { %p655_p5 = scmp.ge.s32.totalorder %s790_s14, 1  ;;  %p228_p6 = scmp.lt.s32.totalorder %s790_s14, 3 }
  0x24   : > { %p229_p7 = pnand %p655_p5, %p228_p6 }
  0x25   : > { %s235_s27 = sand.u32 (!%p229_p7), 1, %s782_s12   ;;  %v792_v32 = vmov (!%p229_p7), 0   ;;  %v275_v1 = vld [vmem:[%s973_s0] sm:$0xff] (!%p229_p7)  ;;  %s657_s5 = sshll.u32 (!%p229_p7), %s648_s15, 2  ;;  %v311_v3 = vlaneseq (!%p229_p7) }
  0x26   : > { %232 = sbr.rel (%p229_p7) target bundleno = 289 (0x121), region = 51  ;;  %s656_s28 = sshll.u32 (!%p229_p7), %s235_s27, 8  ;;  %523 = vmatprep.mubr.bf16.mxu0 (!%p229_p7), %v792_v32  ;;  %564 = vmatprep.mubr.bf16.mxu1 (!%p229_p7), %v792_v32  ;;  %v276_v2 = vpack.c.bf16 (!%p229_p7), %v275_v1, %v275_v1 }
  0x27   : > { %s918_s29 = scalar_lea.vmem (!%p229_p7), [#allocation2], %s656_s28  ;;  %p264_p8 = scmp.lt.s32.totalorder (!%p229_p7), %s657_s5, 7  ;;  %v312_v4 = vshrl.u32 (!%p229_p7), %v311_v3, 7 }
  0x28   : > { %v720_v33 = vld [vmem:[%s918_s29 + $0x4] ss:$16 sps:$4 sm:$0xff] (!%p229_p7)   ;;  %v722_v34 = vld [vmem:[%s918_s29 + $0xc] ss:$16 sps:$4 sm:$0xff] (!%p229_p7)   ;;  %v724_v35 = vld [vmem:[%s918_s29] ss:$16 sps:$4 sm:$0xff] (!%p229_p7)  }
  0x29   : > { %491 = vmatprep.subr.bf16.mxu0 (!%p229_p7), %v720_v33  ;;  %v725_v36 = vld [vmem:[%s918_s29 + $0x8] ss:$16 sps:$4 sm:$0xff] (!%p229_p7)   ;;  %532 = vmatprep.subr.bf16.mxu1 (!%p229_p7), %v722_v34  ;;  %v726_v37 = vld [vmem:[%s918_s29 + $0x24] ss:$16 sps:$4 sm:$0xff] (!%p229_p7)   ;;  %v728_v38 = vld [vmem:[%s918_s29 + $0x2c] ss:$16 sps:$4 sm:$0xff] (!%p229_p7)  }
  0x2a   : > { %492 = vmatpush1.bf16.msra.mxu0 (!%p229_p7), %v724_v35  ;;  %533 = vmatpush1.bf16.msra.mxu1 (!%p229_p7), %v725_v36  ;;  %v730_v39 = vld [vmem:[%s918_s29 + $0x20] ss:$16 sps:$4 sm:$0xff] (!%p229_p7)   ;;  %v731_v40 = vld [vmem:[%s918_s29 + $0x28] ss:$16 sps:$4 sm:$0xff] (!%p229_p7)   ;;  %v732_v41 = vld [vmem:[%s918_s29 + $0x44] ss:$16 sps:$4 sm:$0xff] (!%p229_p7)  }
  0x2b   : > { %493 = vmatprep.subr.bf16.mxu0 (!%p229_p7), %v726_v37  ;;  %534 = vmatprep.subr.bf16.mxu1 (!%p229_p7), %v728_v38  ;;  %v734_v42 = vld [vmem:[%s918_s29 + $0x4c] ss:$16 sps:$4 sm:$0xff] (!%p229_p7)   ;;  %v736_v43 = vld [vmem:[%s918_s29 + $0x40] ss:$16 sps:$4 sm:$0xff] (!%p229_p7)   ;;  %v737_v44 = vld [vmem:[%s918_s29 + $0x48] ss:$16 sps:$4 sm:$0xff] (!%p229_p7)  }
  0x2c   : > { %v738_v45 = vld [vmem:[%s918_s29 + $0x64] ss:$16 sps:$4 sm:$0xff] (!%p229_p7)   ;;  %v740_v46 = vld [vmem:[%s918_s29 + $0x6c] ss:$16 sps:$4 sm:$0xff] (!%p229_p7)   ;;  %v742_v47 = vld [vmem:[%s918_s29 + $0x60] ss:$16 sps:$4 sm:$0xff] (!%p229_p7)  }
  0x2d   : > { %v743_v48 = vld [vmem:[%s918_s29 + $0x68] ss:$16 sps:$4 sm:$0xff]   ;;  %v744_v49 = vld [vmem:[%s918_s29 + $0x84] ss:$16 sps:$4 sm:$0xff]   ;;  %v746_v50 = vld [vmem:[%s918_s29 + $0x8c] ss:$16 sps:$4 sm:$0xff]  }
  0x2e   : > { %494 = vmatpush1.bf16.msra.mxu0 %v730_v39  ;;  %535 = vmatpush1.bf16.msra.mxu1 %v731_v40  ;;  %v748_v51 = vld [vmem:[%s918_s29 + $0x80] ss:$16 sps:$4 sm:$0xff]   ;;  %v749_v52 = vld [vmem:[%s918_s29 + $0x88] ss:$16 sps:$4 sm:$0xff]   ;;  %v750_v53 = vld [vmem:[%s918_s29 + $0xa4] ss:$16 sps:$4 sm:$0xff]  }
  0x2f   : > { %495 = vmatprep.subr.bf16.mxu0 %v732_v41  ;;  %536 = vmatprep.subr.bf16.mxu1 %v734_v42  ;;  %v752_v54 = vld [vmem:[%s918_s29 + $0xac] ss:$16 sps:$4 sm:$0xff]   ;;  %v754_v55 = vld [vmem:[%s918_s29 + $0xa0] ss:$16 sps:$4 sm:$0xff]   ;;  %v755_v56 = vld [vmem:[%s918_s29 + $0xa8] ss:$16 sps:$4 sm:$0xff]  }
  0x30   : > { %v756_v57 = vld [vmem:[%s918_s29 + $0xc4] ss:$16 sps:$4 sm:$0xff]   ;;  %v758_v58 = vld [vmem:[%s918_s29 + $0xcc] ss:$16 sps:$4 sm:$0xff]   ;;  %v760_v59 = vld [vmem:[%s918_s29 + $0xc0] ss:$16 sps:$4 sm:$0xff]  }
  0x31   : > { %v761_v60 = vld [vmem:[%s918_s29 + $0xc8] ss:$16 sps:$4 sm:$0xff]   ;;  %v762_v61 = vld [vmem:[%s918_s29 + $0xe4] ss:$16 sps:$4 sm:$0xff]   ;;  %v764_v62 = vld [vmem:[%s918_s29 + $0xec] ss:$16 sps:$4 sm:$0xff]  }
  0x32   : > { %496 = vmatpush1.bf16.msra.mxu0 %v736_v43  ;;  %537 = vmatpush1.bf16.msra.mxu1 %v737_v44  ;;  %v766_v63 = vld [vmem:[%s918_s29 + $0xe0] ss:$16 sps:$4 sm:$0xff]   ;;  %v767_v0 = vld [vmem:[%s918_s29 + $0xe8] ss:$16 sps:$4 sm:$0xff]   ;;  %s981_s5 = smov (!%p264_p8, %s657_s5), 7  ;;  %v313_v5 = vsub.s32 0, %v312_v4 }
  0x33   : > { %497 = vmatprep.subr.bf16.mxu0 %v738_v45  ;;  %538 = vmatprep.subr.bf16.mxu1 %v740_v46  ;;  %s266_s8 = scalar_lea.vmem %s975_s2, %s981_s5  ;;  %v321_v6 = vsub.s32 2, %v312_v4  ;;  %v317_v8 = vsub.s32 1, %v312_v4  ;;  %v325_v9 = vsub.s32 3, %v312_v4  ;;  %s659_s9 = sshll.u32 %s981_s5, 3 }
  0x34   : > { %v309_v7 = vld [vmem:[%s266_s8] sm:$0xf]  ;;  %s272_s12 = scalar_lea.vmem %s976_s3, %s659_s9 }
  0x35   : > { %v314_v10 = vrot.slane %v309_v7, %v313_v5  ;;  %v322_v11 = vrot.slane %v309_v7, %v321_v6  ;;  %v318_v12 = vrot.slane %v309_v7, %v317_v8  ;;  %v326_v13 = vrot.slane %v309_v7, %v325_v9 }
  0x36   : > { %498 = vmatpush1.bf16.msra.mxu0 %v742_v47  ;;  %539 = vmatpush1.bf16.msra.mxu1 %v743_v48 }
  0x37   : > { %499 = vmatprep.subr.bf16.mxu0 %v744_v49  ;;  %540 = vmatprep.subr.bf16.mxu1 %v746_v50 }
  0x3a   : > { %500 = vmatpush1.bf16.msra.mxu0 %v748_v51  ;;  %541 = vmatpush1.bf16.msra.mxu1 %v749_v52 }
  0x3b   : > { %501 = vmatprep.subr.bf16.mxu0 %v750_v53  ;;  %542 = vmatprep.subr.bf16.mxu1 %v752_v54 }
  0x3e   : > { %502 = vmatpush1.bf16.msra.mxu0 %v754_v55  ;;  %543 = vmatpush1.bf16.msra.mxu1 %v755_v56 }
  0x3f   : > { %503 = vmatprep.subr.bf16.mxu0 %v756_v57  ;;  %544 = vmatprep.subr.bf16.mxu1 %v758_v58 }
  0x42   : > { %504 = vmatpush1.bf16.msra.mxu0 %v760_v59  ;;  %545 = vmatpush1.bf16.msra.mxu1 %v761_v60 }
  0x43   : > { %505 = vmatprep.subr.bf16.mxu0 %v762_v61  ;;  %546 = vmatprep.subr.bf16.mxu1 %v764_v62 }
  0x46   : > { %506 = vmatpush1.bf16.msra.mxu0 %v766_v63  ;;  %547 = vmatpush1.bf16.msra.mxu1 %v767_v0 }
  0x49   : > { %524 = vmatmul.mubr.bf16.vlgmr.msra.gmra.mrb[0].mxu0 %v276_v2  ;;  %565 = vmatmul.mubr.bf16.vlgmr.msra.gmra.mrb[0].mxu1 %v276_v2 }
 0x11c   : > { %v525_v14 = vpop.f32.mrb[0].mxu0  ;;  %v566_v15 = vpop.f32.mrb[0].mxu1 }
 0x11d   : > { %v526_v16 = vadd.f32 %v525_v14, %v314_v10  ;;  %v567_v17 = vadd.f32 %v566_v15, %v322_v11  ;;  %v527_v18 = vpop.f32.mrb[1].mxu0  ;;  %v568_v19 = vpop.f32.mrb[1].mxu1 }
 0x11e   : > { %v528_v20 = vadd.f32 %v527_v18, %v318_v12  ;;  %v569_v21 = vadd.f32 %v568_v19, %v326_v13  ;;  %v529_v22 = vpop.f32.mrb[2].mxu0  ;;  %v570_v23 = vpop.f32.mrb[2].mxu1 }
 0x11f   : > { %573 = vst [vmem:[%s272_s12] sm:$0xff] %v526_v16  ;;  %v530_v24 = vpop.f32.mrb[3].mxu0  ;;  %v571_v25 = vpop.f32.mrb[3].mxu1  ;;  %575 = vst [vmem:[%s272_s12 + $0x10] sm:$0xff] %v567_v17 }
 0x120   : > { %574 = vst [vmem:[%s272_s12 + $0x8] sm:$0xff] %v528_v20  ;;  %576 = vst [vmem:[%s272_s12 + $0x18] sm:$0xff] %v569_v21 }
 0x121 PF: > { %p10_p9 = scmp.ge.s32.totalorder %s830_s16, 4   ;;  %s977_s12 = smov %s786_s13 }
 0x122   : > { %s978_s13 = smov %s839_s19  ;;  %s979_s14 = smov %s830_s16 }
 0x123   :  { %12 = sbr.rel (!%p10_p9) target bundleno = 2 (0x2), region = 93 }

// kernel: attn_decoder_forward.2
= control target key start
LH: loop header
LB: loop body
LE: loop exit
PB: predicated region body
PF: predicated region fallthrough
CT: control target
= control target key end

     0   :  { %v93_v19 = vlaneseq  ;;  %v1614_v24 = vmov 0   ;;  %vm217_vm0 = vcmask 1041409   ;;  %vm219_vm1 = vcmask 1042434   ;;  %s2397_s2 = inlined_call_operand.vmem [shape: f32[8,8,128], index: 2, kind: input, shape index: {}]   ;;  %s2398_s4 = inlined_call_operand.vmem [shape: f32[1,128], index: 4, kind: input, shape index: {}]   ;;  %s2399_s1 = inlined_call_operand.vmem [shape: f32[8,128], index: 1, kind: input, shape index: {}]   ;;  %s2400_s3 = inlined_call_operand.vmem [shape: f32[1,128], index: 3, kind: input, shape index: {}]   ;;  %s2401_s5 = inlined_call_operand.<no memory space> [shape: f32[1,1], index: 5, kind: input, shape index: {}]   ;;  %s2402_s7 = inlined_call_operand.vmem [shape: f32[128,384], index: 7, kind: input, shape index: {}]   ;;  %s2403_s6 = inlined_call_operand.vmem [shape: f32[128,384], index: 6, kind: input, shape index: {}]   ;;  %s2404_s12 = inlined_call_operand.vmem [shape: f32[8,8], index: 12, kind: output, shape index: {1}]   ;;  %s2405_s9 = inlined_call_operand.vmem [shape: f32[128,384], index: 9, kind: input, shape index: {}]   ;;  %s2406_s0 = inlined_call_operand.vmem [shape: f32[8,128], index: 0, kind: input, shape index: {}]   ;;  %s2407_s10 = inlined_call_operand.vmem [shape: f32[1,384], index: 10, kind: input, shape index: {}]   ;;  %s2408_s8 = inlined_call_operand.vmem [shape: f32[1,384], index: 8, kind: input, shape index: {}]   ;;  %s2409_s11 = inlined_call_operand.vmem [shape: f32[8,128], index: 11, kind: output, shape index: {0}]  }
   0x1   :  { %v1686_v0 = vld [vmem:[%s2397_s2 + $0x8] sm:$0xff]  ;;  %v1230_v1 = vld [vmem:[%s2398_s4] ss:$0 sm:$0xff]  ;;  %v1701_v5 = vld [vmem:[%s2397_s2 + $0x10] sm:$0xff]  ;;  %1570 = vset.pattern.permute.xlu0 %v1614_v24  ;;  %1569 = vset.pattern.permute.xlu1 %v1614_v24  ;;  %v142_v31 = vstv %s2401_s5  ;;  %vm221_vm2 = vcmask 1043459   ;;  %vm223_vm3 = vcmask 1044484  }
   0x2   :  { %v42_v2 = vld [vmem:[%s2399_s1] sm:$0xff]  ;;  %v69_v3 = vmul.f32 %v1230_v1, %v1686_v0  ;;  %v70_v8 = vmul.f32 %v1230_v1, %v1701_v5  ;;  %v1718_v11 = vld [vmem:[%s2397_s2 + $0x18] sm:$0xff]  ;;  %v1725_v14 = vld [vmem:[%s2397_s2 + $0x30] sm:$0xff]  ;;  %v94_v21 = vshrl.u32 %v93_v19, 7  ;;  %v184_v22 = vand.u32 127, %v93_v19 }
   0x3   :  { %v1229_v4 = vld [vmem:[%s2400_s3] ss:$0 sm:$0xff]  ;;  %v71_v13 = vmul.f32 %v1230_v1, %v1718_v11  ;;  %v1730_v15 = vld [vmem:[%s2397_s2 + $0x28] sm:$0xff]  ;;  %v74_v16 = vmul.f32 %v1230_v1, %v1725_v14  ;;  %v1737_v18 = vld [vmem:[%s2397_s2 + $0x38] sm:$0xff]  ;;  %vm225_vm4 = vcmask 1045509   ;;  %vm227_vm5 = vcmask 1046534  }
   0x4   :  { %v1706_v6 = vld [vmem:[%s2397_s2] sm:$0xff]  ;;  %v58_v7 = vmul.f32 %v1229_v4, %v42_v2  ;;  %78 = vadd.xlane.f32.xlu1 %v69_v3  ;;  %v73_v17 = vmul.f32 %v1230_v1, %v1730_v15  ;;  %v75_v20 = vmul.f32 %v1230_v1, %v1737_v18  ;;  %v1740_v23 = vsub.s32 %v184_v22, %v94_v21 }
   0x5   :  { %v68_v9 = vmul.f32 %v1230_v1, %v1706_v6  ;;  %v1713_v10 = vld [vmem:[%s2397_s2 + $0x20] sm:$0xff]  ;;  %v1742_v25 = vsub.s32 1, %v94_v21  ;;  %v1744_v27 = vsub.s32 0, %v94_v21  ;;  %v1746_v29 = vsub.s32 2, %v94_v21 }
   0x6   :  { %59 = vadd.xlane.f32.xlu0 %v58_v7  ;;  %v72_v12 = vmul.f32 %v1230_v1, %v1713_v10  ;;  %v1756_v39 = vsub.s32 3, %v94_v21  ;;  %v1761_v43 = vsub.s32 4, %v94_v21  ;;  %v1768_v49 = vsub.s32 5, %v94_v21 }
   0x7   :  { %v1773_v53 = vsub.s32 6, %v94_v21  ;;  %v1780_v59 = vsub.s32 7, %v94_v21  ;;  %vm229_vm6 = vcmask 1047559   ;;  %vm232_vm7 = vcmask 64512  }
   0x8   :  { %80 = vadd.xlane.f32.xlu1 %v70_v8  ;;  %vm1617_vm8 = vmmov 0  }
   0xa   :  { %76 = vadd.xlane.f32.xlu0 %v68_v9 }
   0xc   :  { %84 = vadd.xlane.f32.xlu1 %v72_v12 }
   0xe   :  { %82 = vadd.xlane.f32.xlu0 %v71_v13 }
  0x10   :  { %88 = vadd.xlane.f32.xlu1 %v74_v16 }
  0x12   :  { %86 = vadd.xlane.f32.xlu0 %v73_v17 }
  0x16   :  { %90 = vadd.xlane.f32.xlu0 %v75_v20 }
  0x91   :  { %v79_v26 = vpop.xlane.xlu1 %78 }
  0x93   :  { %v60_v28 = vpop.xlane.xlu0 %59 }
  0x94   :  { %v100_v30 = vrot.slane %v60_v28, %v1742_v25  ;;  %v96_v32 = vrot.slane %v60_v28, %v1744_v27  ;;  %v104_v36 = vrot.slane %v60_v28, %v1746_v29  ;;  %v108_v44 = vrot.slane %v60_v28, %v1756_v39 }
  0x95   :  { %v81_v34 = vpop.xlane.xlu1 %80  ;;  %v112_v48 = vrot.slane %v60_v28, %v1761_v43  ;;  %v116_v54 = vrot.slane %v60_v28, %v1768_v49  ;;  %v120_v58 = vrot.slane %v60_v28, %v1773_v53  ;;  %v124_v63 = vrot.slane %v60_v28, %v1780_v59 }
  0x96   :  { %v134_v33 = vadd.f32 %v100_v30, %v79_v26  ;;  %v135_v40 = vadd.f32 %v104_v36, %v81_v34 }
  0x97   :  { %v77_v35 = vpop.xlane.xlu0 %76 }
  0x98   :  { %v133_v37 = vadd.f32 %v96_v32, %v77_v35  ;;  %v1754_v38 = vadd.f32 %v142_v31, %v134_v33  ;;  %v1765_v45 = vadd.f32 %v142_v31, %v135_v40 }
  0x99   :  { %v85_v47 = vpop.xlane.xlu1 %84 }
  0x9a   :  { %v1758_v41 = vadd.f32 %v142_v31, %v133_v37  ;;  %163 = vperm.xlu0 %1570, %v1754_v38   ;;  %v137_v50 = vadd.f32 %v112_v48, %v85_v47 }
  0x9b   :  { %v83_v42 = vpop.xlane.xlu0 %82 }
  0x9c   :  { %160 = vperm.xlu1 %1569, %v1758_v41   ;;  %v136_v46 = vadd.f32 %v108_v44, %v83_v42  ;;  %v1777_v55 = vadd.f32 %v142_v31, %v137_v50 }
  0x9d   :  { %v89_v57 = vpop.xlane.xlu1 %88 }
  0x9e   :  { %v1771_v51 = vadd.f32 %v142_v31, %v136_v46  ;;  %v139_v60 = vadd.f32 %v120_v58, %v89_v57 }
  0x9f   :  { %v87_v52 = vpop.xlane.xlu0 %86 }
  0xa0   :  { %166 = vperm.xlu1 %1569, %v1765_v45   ;;  %v138_v56 = vadd.f32 %v116_v54, %v87_v52  ;;  %v1787_v1 = vadd.f32 %v142_v31, %v139_v60 }
  0xa2   :  { %v1783_v61 = vadd.f32 %v142_v31, %v138_v56 }
  0xa3   :  { %v91_v62 = vpop.xlane.xlu0 %90 }
  0xa4   :  { %169 = vperm.xlu1 %1569, %v1771_v51   ;;  %v140_v2 = vadd.f32 %v124_v63, %v91_v62 }
  0xa6   :  { %v1790_v3 = vadd.f32 %v142_v31, %v140_v2 }
  0xa8   :  { %172 = vperm.xlu1 %1569, %v1777_v55  }
  0xac   :  { %175 = vperm.xlu1 %1569, %v1783_v61  }
  0xb0   :  { %178 = vperm.xlu1 %1569, %v1787_v1  }
  0xb4   :  { %181 = vperm.xlu1 %1569, %v1790_v3  }
 0x119   :  { %v164_v12 = vpop.permute.xlu0 %163 }
 0x11a   :  { %v192_v19 = vrot.slane %v164_v12, %v1740_v23 }
 0x11b   :  { %v161_v4 = vpop.permute.xlu1 %160 }
 0x11c   :  { %v188_v16 = vrot.slane %v161_v4, %v1740_v23 }
 0x11e   :  { %v218_v24 = vsel %vm217_vm0, %v192_v19, %v188_v16 }
 0x11f   :  { %v167_v7 = vpop.permute.xlu1 %166 }
 0x120   :  { %v196_v17 = vrot.slane %v167_v7, %v1740_v23 }
 0x122   :  { %v220_v28 = vsel %vm219_vm1, %v196_v17, %v218_v24 }
 0x123   :  { %v170_v8 = vpop.permute.xlu1 %169 }
 0x124   :  { %v200_v20 = vrot.slane %v170_v8, %v1740_v23 }
 0x126   :  { %v222_v31 = vsel %vm221_vm2, %v200_v20, %v220_v28 }
 0x127   :  { %v173_v9 = vpop.permute.xlu1 %172 }
 0x128   :  { %v204_v21 = vrot.slane %v173_v9, %v1740_v23 }
 0x12a   :  { %v224_v32 = vsel %vm223_vm3, %v204_v21, %v222_v31 }
 0x12b   :  { %v176_v13 = vpop.permute.xlu1 %175 }
 0x12c   :  { %v208_v26 = vrot.slane %v176_v13, %v1740_v23 }
 0x12e   :  { %v226_v34 = vsel %vm225_vm4, %v208_v26, %v224_v32 }
 0x12f   :  { %v179_v22 = vpop.permute.xlu1 %178 }
 0x130   :  { %v212_v30 = vrot.slane %v179_v22, %v1740_v23 }
 0x132   :  { %v228_v36 = vsel %vm227_vm5, %v212_v30, %v226_v34 }
 0x133   :  { %v182_v33 = vpop.permute.xlu1 %181 }
 0x134   :  { %v216_v35 = vrot.slane %v182_v33, %v1740_v23 }
 0x136   :  { %v230_v37 = vsel %vm229_vm6, %v216_v35, %v228_v36 }
 0x137   :  { %v233_v40 = vsel %vm232_vm7, %v230_v37, -inf }
 0x138   :  { %234 = vmax.xlane.f32.xlu1 %v233_v40 }
 0x1c5   :  { %v235_v42 = vpop.xlane.xlu1 %234 }
 0x1c6   :  { %v240_v44 = vrot.slane %v235_v42, %v1744_v27  ;;  %v244_v46 = vrot.slane %v235_v42, %v1742_v25  ;;  %v248_v47 = vrot.slane %v235_v42, %v1746_v29  ;;  %v252_v54 = vrot.slane %v235_v42, %v1756_v39 }
 0x1c7   :  { %v256_v58 = vrot.slane %v235_v42, %v1761_v43  ;;  %v260_v63 = vrot.slane %v235_v42, %v1768_v49 }
 0x1c8   :  { %v277_v48 = vsub.f32 %v1758_v41, %v240_v44  ;;  %v278_v50 = vsub.f32 %v1754_v38, %v244_v46  ;;  %v279_v56 = vsub.f32 %v1765_v45, %v248_v47  ;;  %v280_v60 = vsub.f32 %v1771_v51, %v252_v54 }
 0x1c9   :  { %v281_v2 = vsub.f32 %v1777_v55, %v256_v58  ;;  %v264_v45 = vrot.slane %v235_v42, %v1773_v53  ;;  %v282_v4 = vsub.f32 %v1783_v61, %v260_v63  ;;  %v268_v51 = vrot.slane %v235_v42, %v1780_v59 }
 0x1ca   :  { %v285_v52 = vmul.f32 1.442695, %v277_v48  ;;  %v287_v57 = vmul.f32 1.442695, %v278_v50  ;;  %v289_v62 = vmul.f32 1.442695, %v279_v56 }
 0x1cb   :  { %v291_v41 = vmul.f32 1.442695, %v280_v60  ;;  %v293_v7 = vmul.f32 1.442695, %v281_v2  ;;  %v283_v55 = vsub.f32 %v1787_v1, %v264_v45  ;;  %v295_v9 = vmul.f32 1.442695, %v282_v4 }
 0x1cc   :  { %1571 = vpow2.f32 %v285_v52  ;;  %v284_v13 = vsub.f32 %v1790_v3, %v268_v51 }
 0x1cd   :  { %1573 = vpow2.f32 %v287_v57  ;;  %v297_v61 = vmul.f32 1.442695, %v283_v55 }
 0x1ce   :  { %1575 = vpow2.f32 %v289_v62  ;;  %v299_v17 = vmul.f32 1.442695, %v284_v13 }
 0x1cf   :  { %1577 = vpow2.f32 %v291_v41 }
 0x1d0   :  { %1579 = vpow2.f32 %v293_v7 }
 0x1d1   :  { %1581 = vpow2.f32 %v295_v9 }
 0x1d2   :  { %1583 = vpow2.f32 %v297_v61 }
 0x1d3   :  { %1585 = vpow2.f32 %v299_v17 }
 0x1d6   :  { %v1820_v38 = vpop.eup %1571 }
 0x1d7   :  { %310 = vperm.xlu0 %1570, %v1820_v38   ;;  %v1825_v8 = vpop.eup %1573 }
 0x1d8   :  { %v1830_v12 = vpop.eup %1575 }
 0x1d9   :  { %v1834_v16 = vpop.eup %1577 }
 0x1da   :  { %v1837_v19 = vpop.eup %1579 }
 0x1db   :  { %313 = vperm.xlu0 %1570, %v1825_v8   ;;  %v1840_v1 = vpop.eup %1581 }
 0x1dc   :  { %v1584_v20 = vpop.eup %1583 }
 0x1dd   :  { %v1843_v3 = vpop.eup %1585 }
 0x1df   :  { %316 = vperm.xlu0 %1570, %v1830_v12  }
 0x1e3   :  { %319 = vperm.xlu0 %1570, %v1834_v16  }
 0x1e7   :  { %322 = vperm.xlu0 %1570, %v1837_v19  }
 0x1eb   :  { %325 = vperm.xlu0 %1570, %v1840_v1  }
 0x1ef   :  { %328 = vperm.xlu0 %1570, %v1584_v20  }
 0x1f3   :  { %331 = vperm.xlu0 %1570, %v1843_v3  }
 0x256   :  { %v311_v21 = vpop.permute.xlu0 %310 }
 0x257   :  { %v336_v33 = vrot.slane %v311_v21, %v1740_v23 }
 0x25a   :  { %v314_v22 = vpop.permute.xlu0 %313 }
 0x25b   :  { %v340_v31 = vrot.slane %v314_v22, %v1740_v23 }
 0x25d   :  { %v365_v37 = vsel %vm217_vm0, %v340_v31, %v336_v33  ;;  %v637_v33 = vld [vmem:[%s2402_s7 + $0x50] sm:$0xff] }
 0x25e   :  { %v317_v24 = vpop.permute.xlu0 %316 }
 0x25f   :  { %v344_v32 = vrot.slane %v317_v24, %v1740_v23  ;;  %v632_v24 = vld [vmem:[%s2402_s7 + $0x28] sm:$0xff] }
 0x261   :  { %v366_v42 = vsel %vm219_vm1, %v344_v32, %v365_v37  ;;  %v634_v32 = vld [vmem:[%s2402_s7 + $0x38] sm:$0xff] }
 0x262   :  { %v320_v26 = vpop.permute.xlu0 %319 }
 0x263   :  { %v348_v34 = vrot.slane %v320_v26, %v1740_v23 }
 0x265   :  { %v367_v46 = vsel %vm221_vm2, %v348_v34, %v366_v42  ;;  %v1393_v34 = vpack.c.bf16 %v637_v33, %v634_v32  ;;  %v663_v32 = vld [vmem:[%s2402_s7 + $0x120] sm:$0xff]  ;;  %v666_v33 = vld [vmem:[%s2402_s7 + $0x138] sm:$0xff] }
 0x266   :  { %v323_v28 = vpop.permute.xlu0 %322 }
 0x267   :  { %v352_v35 = vrot.slane %v323_v28, %v1740_v23  ;;  %v1615_v28 = vmov 0.0|0.0  }
 0x268   :  { %1421 = vmatprep.subr.bf16.mxu1 %v1615_v28 }
 0x269   :  { %v368_v47 = vsel %vm223_vm3, %v352_v35, %v367_v46  ;;  %v636_v35 = vld [vmem:[%s2402_s7 + $0x48] sm:$0xff] }
 0x26a   :  { %v326_v30 = vpop.permute.xlu0 %325 }
 0x26b   :  { %v356_v40 = vrot.slane %v326_v30, %v1740_v23 }
 0x26d   :  { %v369_v50 = vsel %vm225_vm4, %v356_v40, %v368_v47  ;;  %v638_v40 = vld [vmem:[%s2402_s7 + $0x58] sm:$0xff]  ;;  %v640_v47 = vld [vmem:[%s2402_s7 + $0x68] sm:$0xff] }
 0x26e   :  { %v329_v36 = vpop.permute.xlu0 %328 }
 0x26f   :  { %v360_v44 = vrot.slane %v329_v36, %v1740_v23  ;;  %v635_v36 = vld [vmem:[%s2402_s7 + $0x40] sm:$0xff] }
 0x271   :  { %v370_v54 = vsel %vm227_vm5, %v360_v44, %v369_v50  ;;  %v1425_v44 = vpack.c.bf16 %v638_v40, %v635_v36  ;;  %v670_v36 = vld [vmem:[%s2402_s7 + $0x158] sm:$0xff]  ;;  %v1616_v40 = vmov 0.0  }
 0x272   :  { %v332_v48 = vpop.permute.xlu0 %331  ;;  %755 = vmatprep.mubr.f32.mxu0 %v1616_v40  ;;  %1316 = vmatprep.mubr.msk.f32.mxu1 %vm1617_vm8, %v1616_v40 }
 0x273   :  { %v364_v52 = vrot.slane %v332_v48, %v1740_v23  ;;  %v643_v48 = vld [vmem:[%s2402_s7 + $0x80] sm:$0xff] }
 0x274   :  { %v1397_v50 = vpack.c.bf16 %v643_v48, %v640_v47  ;;  %v672_v47 = vld [vmem:[%s2402_s7 + $0x168] sm:$0xff]  ;;  %v671_v48 = vld [vmem:[%s2402_s7 + $0x160] sm:$0xff] }
 0x275   :  { %v371_v56 = vsel %vm229_vm6, %v364_v52, %v370_v54  ;;  %v639_v52 = vld [vmem:[%s2402_s7 + $0x60] sm:$0xff]  ;;  %v641_v54 = vld [vmem:[%s2402_s7 + $0x70] sm:$0xff] }
 0x276   :  { %v373_v57 = vsel %vm232_vm7, %v371_v56, 0.0 }
 0x277   :  { %374 = vadd.xlane.f32.xlu1 %v373_v57  ;;  %v644_v57 = vld [vmem:[%s2402_s7 + $0x88] sm:$0xff] }
 0x304   :  { %v375_v58 = vpop.xlane.xlu1 %374 }
 0x305   :  { %v384_v60 = vrot.slane %v375_v58, %v1742_v25  ;;  %v380_v62 = vrot.slane %v375_v58, %v1744_v27  ;;  %v404_v63 = vrot.slane %v375_v58, %v1773_v53  ;;  %v388_v2 = vrot.slane %v375_v58, %v1746_v29 }
 0x306   :  { %v392_v41 = vrot.slane %v375_v58, %v1756_v39  ;;  %v396_v45 = vrot.slane %v375_v58, %v1761_v43  ;;  %v400_v55 = vrot.slane %v375_v58, %v1768_v49  ;;  %v408_v39 = vrot.slane %v375_v58, %v1780_v59  ;;  %v628_v49 = vld [vmem:[%s2402_s7 + $0x8] sm:$0xff]  ;;  %v627_v59 = vld [vmem:[%s2402_s7] sm:$0xff] }
 0x307   :  { %1587 = vrcp.f32 %v384_v60  ;;  %v1428_v60 = vpack.c.bf16 %v644_v57, %v641_v54  ;;  %v583_v54 = vld [vmem:[%s2403_s6 + $0x20] sm:$0xff] }
 0x308   :  { %1589 = vrcp.f32 %v380_v62  ;;  %v646_v62 = vld [vmem:[%s2402_s7 + $0x98] sm:$0xff] }
 0x309   :  { %1591 = vrcp.f32 %v404_v63  ;;  %v649_v63 = vld [vmem:[%s2402_s7 + $0xb0] sm:$0xff] }
 0x30a   :  { %1593 = vrcp.f32 %v388_v2  ;;  %v1401_v2 = vpack.c.bf16 %v649_v63, %v646_v62 }
 0x30b   :  { %1595 = vrcp.f32 %v392_v41  ;;  %v645_v41 = vld [vmem:[%s2402_s7 + $0x90] sm:$0xff] }
 0x30c   :  { %1597 = vrcp.f32 %v396_v45  ;;  %v647_v45 = vld [vmem:[%s2402_s7 + $0xa0] sm:$0xff] }
 0x30d   :  { %1599 = vrcp.f32 %v400_v55  ;;  %v652_v55 = vld [vmem:[%s2402_s7 + $0xc8] sm:$0xff] }
 0x30e   :  { %1601 = vrcp.f32 %v408_v39  ;;  %v653_v39 = vld [vmem:[%s2402_s7 + $0xd0] sm:$0xff] }
 0x311   :  { %v1588_v4 = vpop.eup %1587 }
 0x312   :  { %v1590_v7 = vpop.eup %1589  ;;  %v420_v51 = vmul.f32 %v1588_v4, %v1825_v8 }
 0x313   :  { %v1592_v9 = vpop.eup %1591  ;;  %v418_v53 = vmul.f32 %v1590_v7, %v1820_v38  ;;  %v631_v38 = vld [vmem:[%s2402_s7 + $0x20] sm:$0xff]  ;;  %v650_v7 = vld [vmem:[%s2402_s7 + $0xb8] sm:$0xff] }
 0x314   :  { %v1594_v13 = vpop.eup %1593  ;;  %445 = vperm.xlu1 %1569, %v420_v51   ;;  %v430_v61 = vmul.f32 %v1592_v9, %v1584_v20  ;;  %v1389_v20 = vpack.c.bf16 %v631_v38, %v628_v49  ;;  %v1431_v51 = vpack.c.bf16 %v650_v7, %v647_v45  ;;  %v655_v9 = vld [vmem:[%s2402_s7 + $0xe0] sm:$0xff]  ;;  %v661_v49 = vld [vmem:[%s2402_s7 + $0x110] sm:$0xff] }
 0x315   :  { %442 = vperm.xlu0 %1570, %v418_v53   ;;  %v422_v17 = vmul.f32 %v1594_v13, %v1830_v12  ;;  %v1596_v43 = vpop.eup %1595  ;;  %v630_v12 = vld [vmem:[%s2402_s7 + $0x18] sm:$0xff]  ;;  %v1405_v53 = vpack.c.bf16 %v655_v9, %v652_v55  ;;  %v651_v13 = vld [vmem:[%s2402_s7 + $0xc0] sm:$0xff] }
 0x316   :  { %v424_v8 = vmul.f32 %v1596_v43, %v1834_v16  ;;  %v1598_v21 = vpop.eup %1597  ;;  %v629_v16 = vld [vmem:[%s2402_s7 + $0x10] sm:$0xff]  ;;  %v1391_v22 = vpack.c.bf16 %v630_v12, %v627_v59  ;;  %1390 = vmatprep.subr.bf16.mxu0 %v1389_v20  ;;  %v656_v43 = vld [vmem:[%s2402_s7 + $0xe8] sm:$0xff]  ;;  %v659_v12 = vld [vmem:[%s2402_s7 + $0x100] sm:$0xff] }
 0x317   :  { %v426_v26 = vmul.f32 %v1598_v21, %v1837_v19  ;;  %v1422_v30 = vpack.c.bf16 %v632_v24, %v629_v16  ;;  %v1600_v31 = vpop.eup %1599  ;;  %v633_v19 = vld [vmem:[%s2402_s7 + $0x30] sm:$0xff]  ;;  %v658_v21 = vld [vmem:[%s2402_s7 + $0xf8] sm:$0xff]  ;;  %v660_v59 = vld [vmem:[%s2402_s7 + $0x108] sm:$0xff] }
 0x318   :  { %460 = vperm.xlu1 %1569, %v430_v61   ;;  %1392 = vmatpush1.bf16.msra.mxu0 %v1391_v22  ;;  %v1395_v37 = vpack.c.bf16 %v636_v35, %v633_v19  ;;  %v428_v42 = vmul.f32 %v1600_v31, %v1840_v1  ;;  %v1602_v46 = vpop.eup %1601  ;;  %v642_v1 = vld [vmem:[%s2402_s7 + $0x78] sm:$0xff]  ;;  %v1409_v38 = vpack.c.bf16 %v661_v49, %v658_v21  ;;  %v657_v20 = vld [vmem:[%s2402_s7 + $0xf0] sm:$0xff]  ;;  %v668_v35 = vld [vmem:[%s2402_s7 + $0x148] sm:$0xff] }
 0x319   :  { %448 = vperm.xlu0 %1570, %v422_v17   ;;  %1423 = vmatpush3.bf16.msra.mxu1 %v1422_v30  ;;  %v1399_v56 = vpack.c.bf16 %v642_v1, %v639_v52  ;;  %v432_v58 = vmul.f32 %v1602_v46, %v1843_v3  ;;  %v648_v3 = vld [vmem:[%s2402_s7 + $0xa8] sm:$0xff]  ;;  %v654_v61 = vld [vmem:[%s2402_s7 + $0xd8] sm:$0xff]  ;;  %v1411_v16 = vpack.c.bf16 %v660_v59, %v657_v20  ;;  %v667_v30 = vld [vmem:[%s2402_s7 + $0x140] sm:$0xff] }
 0x31a   :  { %1424 = vmatprep.subr.bf16.mxu1 %v1615_v28  ;;  %1394 = vmatprep.subr.bf16.mxu0 %v1393_v34  ;;  %v1403_v4 = vpack.c.bf16 %v648_v3, %v645_v41  ;;  %v1407_v17 = vpack.c.bf16 %v654_v61, %v651_v13  ;;  %v662_v22 = vld [vmem:[%s2402_s7 + $0x118] sm:$0xff]  ;;  %v665_v34 = vld [vmem:[%s2402_s7 + $0x130] sm:$0xff]  ;;  %v1415_v19 = vpack.c.bf16 %v666_v33, %v663_v32  ;;  %v580_v1 = vld [vmem:[%s2403_s6 + $0x8] sm:$0xff] }
 0x31b   :  { %v1437_v24 = vpack.c.bf16 %v662_v22, %v659_v12  ;;  %v669_v46 = vld [vmem:[%s2402_s7 + $0x150] sm:$0xff]  ;;  %v674_v52 = vld [vmem:[%s2402_s7 + $0x178] sm:$0xff]  ;;  %v1445_v57 = vpack.c.bf16 %v583_v54, %v580_v1 }
 0x31c   :  { %1396 = vmatpush1.bf16.msra.mxu0 %v1395_v37  ;;  %v673_v37 = vld [vmem:[%s2402_s7 + $0x170] sm:$0xff] }
 0x31d   :  { %451 = vperm.xlu0 %1570, %v424_v8   ;;  %1426 = vmatpush3.bf16.msra.mxu1 %v1425_v44  ;;  %v1434_v8 = vpack.c.bf16 %v656_v43, %v653_v39  ;;  %v1417_v44 = vpack.c.bf16 %v673_v37, %v670_v36 }
 0x31e   :  { %1427 = vmatprep.subr.bf16.mxu1 %v1615_v28  ;;  %1398 = vmatprep.subr.bf16.mxu0 %v1397_v50  ;;  %v1419_v50 = vpack.c.bf16 %v672_v47, %v669_v46 }
 0x320   :  { %1400 = vmatpush1.bf16.msra.mxu0 %v1399_v56  ;;  %v1443_v56 = vpack.c.bf16 %v674_v52, %v671_v48 }
 0x321   :  { %454 = vperm.xlu0 %1570, %v426_v26   ;;  %1429 = vmatpush3.bf16.msra.mxu1 %v1428_v60  ;;  %v664_v26 = vld [vmem:[%s2402_s7 + $0x128] sm:$0xff] }
 0x322   :  { %1430 = vmatprep.subr.bf16.mxu1 %v1615_v28  ;;  %1402 = vmatprep.subr.bf16.mxu0 %v1401_v2  ;;  %v1413_v31 = vpack.c.bf16 %v667_v30, %v664_v26 }
 0x324   :  { %1404 = vmatpush1.bf16.msra.mxu0 %v1403_v4 }
 0x325   :  { %457 = vperm.xlu0 %1570, %v428_v42   ;;  %1432 = vmatpush3.bf16.msra.mxu1 %v1431_v51  ;;  %v1440_v42 = vpack.c.bf16 %v668_v35, %v665_v34 }
 0x326   :  { %1433 = vmatprep.subr.bf16.mxu1 %v1615_v28  ;;  %1406 = vmatprep.subr.bf16.mxu0 %v1405_v53 }
 0x328   :  { %1408 = vmatpush1.bf16.msra.mxu0 %v1407_v17 }
 0x329   :  { %463 = vperm.xlu0 %1570, %v432_v58   ;;  %1435 = vmatpush3.bf16.msra.mxu1 %v1434_v8 }
 0x32a   :  { %1436 = vmatprep.subr.bf16.mxu1 %v1615_v28  ;;  %1410 = vmatprep.subr.bf16.mxu0 %v1409_v38 }
 0x32c   :  { %1412 = vmatpush1.bf16.msra.mxu0 %v1411_v16 }
 0x32d   :  { %1438 = vmatpush3.bf16.msra.mxu1 %v1437_v24  ;;  %1414 = vmatprep.subr.bf16.mxu0 %v1413_v31 }
 0x32e   :  { %1439 = vmatprep.subr.bf16.mxu1 %v1615_v28 }
 0x330   :  { %1416 = vmatpush1.bf16.msra.mxu0 %v1415_v19 }
 0x331   :  { %1441 = vmatpush3.bf16.msra.mxu1 %v1440_v42  ;;  %1418 = vmatprep.subr.bf16.mxu0 %v1417_v44 }
 0x332   :  { %1442 = vmatprep.subr.bf16.mxu1 %v1615_v28 }
 0x334   :  { %1420 = vmatpush1.bf16.msra.mxu0 %v1419_v50 }
 0x335   :  { %1444 = vmatpush3.bf16.msra.mxu1 %v1443_v56  ;;  %1446 = vmatprep.subr.bf16.mxu0 %v1445_v57 }
 0x336   :  { %1477 = vmatprep.subr.bf16.mxu1 %v1615_v28 }
 0x393   :  { %v446_v58 = vpop.permute.xlu1 %445 }
 0x394   :  { %v515_v60 = vmul.f32 %v446_v58, %v1686_v0  ;;  %v443_v62 = vpop.permute.xlu0 %442 }
 0x395   :  { %v514_v63 = vmul.f32 %v443_v62, %v1706_v6  ;;  %v472_v6 = vrot.slane %v446_v58, %v1740_v23  ;;  %v468_v43 = vrot.slane %v443_v62, %v1740_v23 }
 0x396   :  { %v528_v2 = vrot.slane %v515_v60, 4 }
 0x397   :  { %v522_v41 = vrot.slane %v514_v63, 4  ;;  %v461_v3 = vpop.permute.xlu1 %460  ;;  %v497_v22 = vsel %vm217_vm0, %v472_v6, %v468_v43 }
 0x398   :  { %v529_v45 = vadd.f32 %v528_v2, %v515_v60  ;;  %v449_v4 = vpop.permute.xlu0 %448  ;;  %v520_v7 = vmul.f32 %v461_v3, %v1725_v14  ;;  %v492_v48 = vrot.slane %v461_v3, %v1740_v23 }
 0x399   :  { %v516_v51 = vmul.f32 %v449_v4, %v1701_v5  ;;  %v523_v55 = vadd.f32 %v522_v41, %v514_v63  ;;  %v476_v14 = vrot.slane %v449_v4, %v1740_v23 }
 0x39a   :  { %v530_v53 = vrot.slane %v529_v45, 2  ;;  %v558_v61 = vrot.slane %v520_v7, 4 }
 0x39b   :  { %v534_v9 = vrot.slane %v516_v51, 4  ;;  %v524_v17 = vrot.slane %v523_v55, 2  ;;  %v498_v31 = vsel %vm219_vm1, %v476_v14, %v497_v22 }
 0x39c   :  { %v452_v13 = vpop.permute.xlu0 %451  ;;  %v531_v49 = vadd.f32 %v530_v53, %v529_v45  ;;  %v559_v5 = vadd.f32 %v558_v61, %v520_v7 }
 0x39d   :  { %v535_v39 = vadd.f32 %v534_v9, %v516_v51  ;;  %v517_v0 = vmul.f32 %v452_v13, %v1718_v11  ;;  %v480_v20 = vrot.slane %v452_v13, %v1740_v23  ;;  %v525_v12 = vadd.f32 %v524_v17, %v523_v55 }
 0x39e   :  { %v532_v30 = vrot.slane %v531_v49, 1  ;;  %v560_v34 = vrot.slane %v559_v5, 2 }
 0x39f   :  { %v536_v8 = vrot.slane %v535_v39, 2  ;;  %v540_v21 = vrot.slane %v517_v0, 4  ;;  %v499_v19 = vsel %vm221_vm2, %v480_v20, %v498_v31  ;;  %v526_v37 = vrot.slane %v525_v12, 1 }
 0x3a0   :  { %v455_v38 = vpop.permute.xlu0 %454  ;;  %v533_v56 = vadd.f32 %v532_v30, %v531_v49  ;;  %v561_v57 = vadd.f32 %v560_v34, %v559_v5  ;;  %v579_v5 = vld [vmem:[%s2403_s6] sm:$0xff]  ;;  %v589_v30 = vld [vmem:[%s2403_s6 + $0x50] sm:$0xff] }
 0x3a1   :  { %v541_v59 = vadd.f32 %v540_v21, %v517_v0  ;;  %v484_v16 = vrot.slane %v455_v38, %v1740_v23  ;;  %v518_v11 = vmul.f32 %v455_v38, %v1713_v10  ;;  %v537_v24 = vadd.f32 %v536_v8, %v535_v39 }
 0x3a2   :  { %v527_v62 = vadd.f32 %v526_v37, %v525_v12  ;;  %v562_v9 = vrot.slane %v561_v57, 1  ;;  %v582_v12 = vld [vmem:[%s2403_s6 + $0x18] sm:$0xff] }
 0x3a3   :  { %v542_v26 = vrot.slane %v541_v59, 2  ;;  %v546_v32 = vrot.slane %v518_v11, 4  ;;  %v500_v42 = vsel %vm223_vm3, %v484_v16, %v499_v19  ;;  %v538_v46 = vrot.slane %v537_v24, 1  ;;  %v581_v16 = vld [vmem:[%s2403_s6 + $0x10] sm:$0xff] }
 0x3a4   :  { %v458_v33 = vpop.permute.xlu0 %457  ;;  %v563_v21 = vadd.f32 %v562_v9, %v561_v57  ;;  %v1447_v34 = vpack.c.bf16 %v582_v12, %v579_v5  ;;  %v593_v57 = vld [vmem:[%s2403_s6 + $0x70] sm:$0xff]  ;;  %v619_v5 = vld [vmem:[%s2403_s6 + $0x140] sm:$0xff] }
 0x3a5   :  { %v543_v35 = vadd.f32 %v542_v26, %v541_v59  ;;  %v488_v36 = vrot.slane %v458_v33, %v1740_v23  ;;  %v547_v44 = vadd.f32 %v546_v32, %v518_v11  ;;  %v519_v10 = vmul.f32 %v458_v33, %v1730_v15  ;;  %v584_v11 = vld [vmem:[%s2403_s6 + $0x28] sm:$0xff]  ;;  %v586_v26 = vld [vmem:[%s2403_s6 + $0x38] sm:$0xff]  ;;  %v615_v12 = vld [vmem:[%s2403_s6 + $0x120] sm:$0xff] }
 0x3a6   :  { %v539_v41 = vadd.f32 %v538_v46, %v537_v24  ;;  %v577_v31 = vmax.f32 %v563_v21, 0.0  ;;  %v1478_v19 = vpack.c.bf16 %v584_v11, %v581_v16  ;;  %v1449_v37 = vpack.c.bf16 %v589_v30, %v586_v26  ;;  %v612_v21 = vld [vmem:[%s2403_s6 + $0x108] sm:$0xff]  ;;  %v618_v11 = vld [vmem:[%s2403_s6 + $0x138] sm:$0xff]  ;;  %v625_v30 = vld [vmem:[%s2403_s6 + $0x170] sm:$0xff] }
 0x3a7   :  { %v501_v47 = vsel %vm225_vm4, %v488_v36, %v500_v42  ;;  %v544_v50 = vrot.slane %v543_v35, 1  ;;  %v548_v52 = vrot.slane %v547_v44, 2  ;;  %v552_v1 = vrot.slane %v519_v10, 4  ;;  %v588_v42 = vld [vmem:[%s2403_s6 + $0x48] sm:$0xff]  ;;  %v622_v26 = vld [vmem:[%s2403_s6 + $0x158] sm:$0xff] }
 0x3a8   :  { %v464_v54 = vpop.permute.xlu0 %463  ;;  %v502_v15 = vsel %vm227_vm5, %v492_v48, %v501_v47  ;;  %v573_v61 = vmax.f32 %v539_v41, 0.0  ;;  %v592_v47 = vld [vmem:[%s2403_s6 + $0x68] sm:$0xff]  ;;  %v595_v48 = vld [vmem:[%s2403_s6 + $0x80] sm:$0xff] }
 0x3a9   :  { %v496_v58 = vrot.slane %v464_v54, %v1740_v23  ;;  %v521_v60 = vmul.f32 %v464_v54, %v1737_v18  ;;  %v549_v63 = vadd.f32 %v548_v52, %v547_v44  ;;  %v553_v2 = vadd.f32 %v552_v1, %v519_v10  ;;  %v587_v44 = vld [vmem:[%s2403_s6 + $0x40] sm:$0xff]  ;;  %v590_v10 = vld [vmem:[%s2403_s6 + $0x58] sm:$0xff] }
 0x3aa   :  { %v545_v3 = vadd.f32 %v544_v50, %v543_v35  ;;  %v572_v23 = vmax.f32 %v533_v56, 0.0  ;;  %v571_v18 = vmax.f32 %v527_v62, 0.0  ;;  %v585_v35 = vld [vmem:[%s2403_s6 + $0x30] sm:$0xff]  ;;  %v1481_v52 = vpack.c.bf16 %v590_v10, %v587_v44  ;;  %v591_v1 = vld [vmem:[%s2403_s6 + $0x60] sm:$0xff]  ;;  %v594_v56 = vld [vmem:[%s2403_s6 + $0x78] sm:$0xff] }
 0x3ab   :  { %v503_v45 = vsel %vm229_vm6, %v496_v58, %v502_v15  ;;  %v564_v4 = vrot.slane %v521_v60, 4  ;;  %v550_v7 = vrot.slane %v549_v63, 1  ;;  %v554_v51 = vrot.slane %v553_v2, 2  ;;  %v596_v58 = vld [vmem:[%s2403_s6 + $0x88] sm:$0xff]  ;;  %v601_v62 = vld [vmem:[%s2403_s6 + $0xb0] sm:$0xff] }
 0x3ac   :  { %505 = vst.msk [vmem:[%s2404_s12] sm:$0xff] %vm232_vm7, %v503_v45  ;;  %v574_v0 = vmax.f32 %v545_v3, 0.0  ;;  %v683_v8 = vsel %vm217_vm0, %v572_v23, %v571_v18  ;;  %v1451_v50 = vpack.c.bf16 %v588_v42, %v585_v35  ;;  %v1453_v54 = vpack.c.bf16 %v595_v48, %v592_v47  ;;  %v597_v15 = vld [vmem:[%s2403_s6 + $0x90] sm:$0xff]  ;;  %v600_v45 = vld [vmem:[%s2403_s6 + $0xa8] sm:$0xff]  ;;  %v602_v3 = vld [vmem:[%s2403_s6 + $0xb8] sm:$0xff] }
 0x3ad   :  { %v565_v55 = vadd.f32 %v564_v4, %v521_v60  ;;  %v551_v53 = vadd.f32 %v550_v7, %v549_v63  ;;  %v555_v13 = vadd.f32 %v554_v51, %v553_v2  ;;  %v684_v14 = vsel %vm219_vm1, %v573_v61, %v683_v8  ;;  %v598_v60 = vld [vmem:[%s2403_s6 + $0x98] sm:$0xff]  ;;  %v599_v4 = vld [vmem:[%s2403_s6 + $0xa0] sm:$0xff]  ;;  %v604_v7 = vld [vmem:[%s2403_s6 + $0xc8] sm:$0xff] }
 0x3ae   :  { %v685_v59 = vsel %vm221_vm2, %v574_v0, %v684_v14  ;;  %v1455_v63 = vpack.c.bf16 %v594_v56, %v591_v1  ;;  %v1484_v2 = vpack.c.bf16 %v596_v58, %v593_v57  ;;  %v1457_v41 = vpack.c.bf16 %v601_v62, %v598_v60  ;;  %v607_v51 = vld [vmem:[%s2403_s6 + $0xe0] sm:$0xff]  ;;  %v608_v61 = vld [vmem:[%s2403_s6 + $0xe8] sm:$0xff]  ;;  %v613_v0 = vld [vmem:[%s2403_s6 + $0x110] sm:$0xff] }
 0x3af   :  { %v566_v39 = vrot.slane %v565_v55, 2  ;;  %v556_v17 = vrot.slane %v555_v13, 1  ;;  %v575_v6 = vmax.f32 %v551_v53, 0.0  ;;  %v1459_v23 = vpack.c.bf16 %v600_v45, %v597_v15  ;;  %v603_v18 = vld [vmem:[%s2403_s6 + $0xc0] sm:$0xff]  ;;  %v606_v53 = vld [vmem:[%s2403_s6 + $0xd8] sm:$0xff]  ;;  %v998_v1 = vld [vmem:[%s2405_s9 + $0x28] sm:$0xff] }
 0x3b0   :  { %v1461_v9 = vpack.c.bf16 %v607_v51, %v604_v7  ;;  %v614_v14 = vld [vmem:[%s2403_s6 + $0x118] sm:$0xff]  ;;  %v623_v35 = vld [vmem:[%s2403_s6 + $0x160] sm:$0xff]  ;;  %v1003_v56 = vld [vmem:[%s2405_s9 + $0x50] sm:$0xff] }
 0x3b1   :  { %v567_v43 = vadd.f32 %v566_v39, %v565_v55  ;;  %v557_v49 = vadd.f32 %v556_v17, %v555_v13  ;;  %v686_v24 = vsel %vm223_vm3, %v575_v6, %v685_v59  ;;  %v1487_v55 = vpack.c.bf16 %v602_v3, %v599_v4  ;;  %v605_v13 = vld [vmem:[%s2403_s6 + $0xd0] sm:$0xff]  ;;  %v610_v39 = vld [vmem:[%s2403_s6 + $0xf8] sm:$0xff]  ;;  %v997_v42 = vld [vmem:[%s2405_s9 + $0x20] sm:$0xff] }
 0x3b2   :  { %v1463_v17 = vpack.c.bf16 %v606_v53, %v603_v18  ;;  %v1490_v6 = vpack.c.bf16 %v608_v61, %v605_v13  ;;  %v1465_v8 = vpack.c.bf16 %v613_v0, %v610_v39  ;;  %v993_v47 = vld [vmem:[%s2405_s9] sm:$0xff]  ;;  %v999_v60 = vld [vmem:[%s2405_s9 + $0x30] sm:$0xff]  ;;  %v1006_v45 = vld [vmem:[%s2405_s9 + $0x68] sm:$0xff] }
 0x3b3   :  { %v568_v38 = vrot.slane %v567_v43, 1  ;;  %v576_v20 = vmax.f32 %v557_v49, 0.0  ;;  %v611_v49 = vld [vmem:[%s2403_s6 + $0x100] sm:$0xff]  ;;  %v1007_v18 = vld [vmem:[%s2405_s9 + $0x70] sm:$0xff]  ;;  %v1012_v53 = vld [vmem:[%s2405_s9 + $0x98] sm:$0xff] }
 0x3b4   :  { %v1493_v59 = vpack.c.bf16 %v614_v14, %v611_v49  ;;  %v1001_v15 = vld [vmem:[%s2405_s9 + $0x40] sm:$0xff]  ;;  %v1015_v13 = vld [vmem:[%s2405_s9 + $0xb0] sm:$0xff] }
 0x3b5   :  { %v569_v22 = vadd.f32 %v568_v38, %v567_v43  ;;  %v687_v32 = vsel %vm225_vm4, %v576_v20, %v686_v24  ;;  %v609_v43 = vld [vmem:[%s2403_s6 + $0xf0] sm:$0xff]  ;;  %v616_v38 = vld [vmem:[%s2403_s6 + $0x128] sm:$0xff]  ;;  %v1009_v4 = vld [vmem:[%s2405_s9 + $0x80] sm:$0xff] }
 0x3b6   :  { %v688_v36 = vsel %vm227_vm5, %v577_v31, %v687_v32  ;;  %v1467_v20 = vpack.c.bf16 %v612_v21, %v609_v43  ;;  %v1469_v16 = vpack.c.bf16 %v619_v5, %v616_v38  ;;  %v620_v24 = vld [vmem:[%s2403_s6 + $0x148] sm:$0xff]  ;;  %v1471_v31 = vpack.c.bf16 %v618_v11, %v615_v12  ;;  %v1005_v7 = vld [vmem:[%s2405_s9 + $0x60] sm:$0xff]  ;;  %v1011_v39 = vld [vmem:[%s2405_s9 + $0x90] sm:$0xff] }
 0x3b7   :  { %v578_v33 = vmax.f32 %v569_v22, 0.0  ;;  %v617_v22 = vld [vmem:[%s2403_s6 + $0x130] sm:$0xff]  ;;  %v1016_v43 = vld [vmem:[%s2405_s9 + $0xb8] sm:$0xff]  ;;  %v1021_v21 = vld [vmem:[%s2405_s9 + $0xe0] sm:$0xff] }
 0x3b8   :  { %v1496_v32 = vpack.c.bf16 %v620_v24, %v617_v22  ;;  %v1017_v14 = vld [vmem:[%s2405_s9 + $0xc0] sm:$0xff]  ;;  %v1022_v12 = vld [vmem:[%s2405_s9 + $0xe8] sm:$0xff]  ;;  %v1027_v11 = vld [vmem:[%s2405_s9 + $0x110] sm:$0xff] }
 0x3b9   :  { %v689_v46 = vsel %vm229_vm6, %v578_v33, %v688_v36  ;;  %v621_v33 = vld [vmem:[%s2403_s6 + $0x150] sm:$0xff]  ;;  %v626_v36 = vld [vmem:[%s2403_s6 + $0x178] sm:$0xff] }
 0x3ba   :  { %756 = vmatmul.mubr.f32.vlgmr.msra.gmra.mrb[0].mxu0 %v689_v46  ;;  %1317 = vmatmul.mubr.f32.vlgmr.msra.gmra.mrb[0].mxu1 %v689_v46  ;;  %v1499_v10 = vpack.c.bf16 %v626_v36, %v623_v35  ;;  %v41_v46 = vld [vmem:[%s2406_s0] sm:$0xff]  ;;  %v1023_v24 = vld [vmem:[%s2405_s9 + $0xf0] sm:$0xff] }
 0x3bb   :  { %1448 = vmatpush1.bf16.msra.mxu0 %v1447_v34  ;;  %1479 = vmatpush3.bf16.msra.mxu1 %v1478_v19  ;;  %v1473_v34 = vpack.c.bf16 %v625_v30, %v622_v26  ;;  %v624_v19 = vld [vmem:[%s2403_s6 + $0x168] sm:$0xff]  ;;  %v570_v57 = vmax.f32 %v41_v46, 0.0  ;;  %v1029_v36 = vld [vmem:[%s2405_s9 + $0x120] sm:$0xff] }
 0x3bc   :  { %1450 = vmatprep.subr.bf16.mxu0 %v1449_v37  ;;  %1480 = vmatprep.subr.bf16.mxu1 %v1615_v28  ;;  %v994_v37 = vld [vmem:[%s2405_s9 + $0x8] sm:$0xff]  ;;  %v1475_v44 = vpack.c.bf16 %v624_v19, %v621_v33  ;;  %v1028_v33 = vld [vmem:[%s2405_s9 + $0x118] sm:$0xff]  ;;  %v1033_v19 = vld [vmem:[%s2405_s9 + $0x140] sm:$0xff] }
 0x3bd   :  { %1351 = vmatprep.mubr.msk.f32.mxu1 %vm1617_vm8, %v1616_v40  ;;  %896 = vmatprep.mubr.f32.mxu0 %v1616_v40  ;;  %v1501_v48 = vpack.c.bf16 %v997_v42, %v994_v37  ;;  %v1034_v46 = vld [vmem:[%s2405_s9 + $0x148] sm:$0xff] }
 0x3bf   :  { %1452 = vmatpush1.bf16.msra.mxu0 %v1451_v50  ;;  %1482 = vmatpush3.bf16.msra.mxu1 %v1481_v52  ;;  %v996_v50 = vld [vmem:[%s2405_s9 + $0x18] sm:$0xff]  ;;  %v995_v52 = vld [vmem:[%s2405_s9 + $0x10] sm:$0xff] }
 0x3c0   :  { %1454 = vmatprep.subr.bf16.mxu0 %v1453_v54  ;;  %1483 = vmatprep.subr.bf16.mxu1 %v1615_v28  ;;  %v1000_v54 = vld [vmem:[%s2405_s9 + $0x38] sm:$0xff]  ;;  %v1503_v58 = vpack.c.bf16 %v996_v50, %v993_v47  ;;  %v1534_v62 = vpack.c.bf16 %v998_v1, %v995_v52  ;;  %v1035_v52 = vld [vmem:[%s2405_s9 + $0x150] sm:$0xff] }
 0x3c1   :  { %v1036_v47 = vld [vmem:[%s2405_s9 + $0x158] sm:$0xff] }
 0x3c3   :  { %1456 = vmatpush1.bf16.msra.mxu0 %v1455_v63  ;;  %1485 = vmatpush3.bf16.msra.mxu1 %v1484_v2  ;;  %v1505_v63 = vpack.c.bf16 %v1003_v56, %v1000_v54  ;;  %v1002_v2 = vld [vmem:[%s2405_s9 + $0x48] sm:$0xff] }
 0x3c4   :  { %1458 = vmatprep.subr.bf16.mxu0 %v1457_v41  ;;  %1486 = vmatprep.subr.bf16.mxu1 %v1615_v28  ;;  %v1004_v41 = vld [vmem:[%s2405_s9 + $0x58] sm:$0xff]  ;;  %v1507_v3 = vpack.c.bf16 %v1002_v2, %v999_v60  ;;  %v1038_v56 = vld [vmem:[%s2405_s9 + $0x168] sm:$0xff] }
 0x3c5   :  { %v1537_v51 = vpack.c.bf16 %v1004_v41, %v1001_v15  ;;  %v1531_v60 = vpack.c.bf16 %v1038_v56, %v1035_v52 }
 0x3c7   :  { %1460 = vmatpush1.bf16.msra.mxu0 %v1459_v23  ;;  %1488 = vmatpush3.bf16.msra.mxu1 %v1487_v55  ;;  %v1509_v23 = vpack.c.bf16 %v1009_v4, %v1006_v45  ;;  %v1008_v55 = vld [vmem:[%s2405_s9 + $0x78] sm:$0xff] }
 0x3c8   :  { %1462 = vmatprep.subr.bf16.mxu0 %v1461_v9  ;;  %1489 = vmatprep.subr.bf16.mxu1 %v1615_v28  ;;  %v1010_v9 = vld [vmem:[%s2405_s9 + $0x88] sm:$0xff]  ;;  %v1511_v61 = vpack.c.bf16 %v1008_v55, %v1005_v7 }
 0x3c9   :  { %v1540_v0 = vpack.c.bf16 %v1010_v9, %v1007_v18 }
 0x3cb   :  { %1464 = vmatpush1.bf16.msra.mxu0 %v1463_v17  ;;  %1491 = vmatpush3.bf16.msra.mxu1 %v1490_v6  ;;  %v1513_v17 = vpack.c.bf16 %v1015_v13, %v1012_v53  ;;  %v1014_v6 = vld [vmem:[%s2405_s9 + $0xa8] sm:$0xff] }
 0x3cc   :  { %1466 = vmatprep.subr.bf16.mxu0 %v1465_v8  ;;  %1492 = vmatprep.subr.bf16.mxu1 %v1615_v28  ;;  %v1018_v8 = vld [vmem:[%s2405_s9 + $0xc8] sm:$0xff]  ;;  %v1515_v49 = vpack.c.bf16 %v1014_v6, %v1011_v39 }
 0x3cd   :  { %v1517_v5 = vpack.c.bf16 %v1021_v21, %v1018_v8 }
 0x3cf   :  { %1468 = vmatpush1.bf16.msra.mxu0 %v1467_v20  ;;  %1494 = vmatpush3.bf16.msra.mxu1 %v1493_v59  ;;  %v1020_v20 = vld [vmem:[%s2405_s9 + $0xd8] sm:$0xff]  ;;  %v1019_v59 = vld [vmem:[%s2405_s9 + $0xd0] sm:$0xff] }
 0x3d0   :  { %1470 = vmatprep.subr.bf16.mxu0 %v1469_v16  ;;  %1495 = vmatprep.subr.bf16.mxu1 %v1615_v28  ;;  %v1024_v16 = vld [vmem:[%s2405_s9 + $0xf8] sm:$0xff]  ;;  %v1519_v22 = vpack.c.bf16 %v1020_v20, %v1017_v14  ;;  %v1546_v26 = vpack.c.bf16 %v1022_v12, %v1019_v59 }
 0x3d1   :  { %v1521_v30 = vpack.c.bf16 %v1027_v11, %v1024_v16 }
 0x3d3   :  { %1472 = vmatpush1.bf16.msra.mxu0 %v1471_v31  ;;  %1497 = vmatpush3.bf16.msra.mxu1 %v1496_v32  ;;  %v1026_v31 = vld [vmem:[%s2405_s9 + $0x108] sm:$0xff]  ;;  %v1025_v32 = vld [vmem:[%s2405_s9 + $0x100] sm:$0xff] }
 0x3d4   :  { %1474 = vmatprep.subr.bf16.mxu0 %v1473_v34  ;;  %1498 = vmatprep.subr.bf16.mxu1 %v1615_v28  ;;  %v1030_v34 = vld [vmem:[%s2405_s9 + $0x128] sm:$0xff]  ;;  %v1523_v35 = vpack.c.bf16 %v1026_v31, %v1023_v24  ;;  %v1549_v37 = vpack.c.bf16 %v1028_v33, %v1025_v32 }
 0x3d5   :  { %v1525_v42 = vpack.c.bf16 %v1033_v19, %v1030_v34 }
 0x3d7   :  { %1476 = vmatpush1.bf16.msra.mxu0 %v1475_v44  ;;  %1500 = vmatpush3.bf16.msra.mxu1 %v1499_v10  ;;  %v1032_v44 = vld [vmem:[%s2405_s9 + $0x138] sm:$0xff]  ;;  %v1031_v10 = vld [vmem:[%s2405_s9 + $0x130] sm:$0xff] }
 0x3d8   :  { %1502 = vmatprep.subr.bf16.mxu0 %v1501_v48  ;;  %1533 = vmatprep.subr.bf16.mxu1 %v1615_v28  ;;  %v1039_v48 = vld [vmem:[%s2405_s9 + $0x170] sm:$0xff]  ;;  %v1527_v50 = vpack.c.bf16 %v1032_v44, %v1029_v36  ;;  %v1552_v1 = vpack.c.bf16 %v1034_v46, %v1031_v10 }
 0x3d9   :  { %v1529_v54 = vpack.c.bf16 %v1039_v48, %v1036_v47 }
 0x3da   :  { %1352 = vmatmul.mubr.f32.vlgmr.msra.gmra.mrb[2].mxu1 %v570_v57  ;;  %897 = vmatmul.mubr.f32.vlgmr.msra.gmra.mrb[0].mxu0 %v570_v57  ;;  %v1037_v57 = vld [vmem:[%s2405_s9 + $0x160] sm:$0xff] }
 0x3db   :  { %1504 = vmatpush1.bf16.msra.mxu0 %v1503_v58  ;;  %1535 = vmatpush3.bf16.msra.mxu1 %v1534_v62  ;;  %v1040_v58 = vld [vmem:[%s2405_s9 + $0x178] sm:$0xff] }
 0x3dc   :  { %1506 = vmatprep.subr.bf16.mxu0 %v1505_v63  ;;  %1536 = vmatprep.subr.bf16.mxu1 %v1615_v28  ;;  %v1555_v62 = vpack.c.bf16 %v1040_v58, %v1037_v57  ;;  %v1613_v63 = vld [vmem:[%s2399_s1] sm:$0xff] }
 0x3dd   :  { %1122 = vmatprep.mubr.f32.mxu0 %v1616_v40  ;;  %1386 = vmatprep.mubr.msk.f32.mxu1 %vm1617_vm8, %v1616_v40  ;;  %v1013_v40 = vld [vmem:[%s2405_s9 + $0xa0] sm:$0xff] }
 0x3de   :  { %v1543_v38 = vpack.c.bf16 %v1016_v43, %v1013_v40 }
 0x3df   :  { %1508 = vmatpush1.bf16.msra.mxu0 %v1507_v3  ;;  %1538 = vmatpush3.bf16.msra.mxu1 %v1537_v51  ;;  %v1041_v3 = vld [vmem:[%s2407_s10] sm:$0x7] }
 0x3e0   :  { %1510 = vmatprep.subr.bf16.mxu0 %v1509_v23  ;;  %1539 = vmatprep.subr.bf16.mxu1 %v1615_v28  ;;  %v1046_v51 = vrot.slane %v1041_v3, %v1744_v27  ;;  %v1050_v55 = vrot.slane %v1041_v3, %v1742_v25 }
 0x3e3   :  { %1512 = vmatpush1.bf16.msra.mxu0 %v1511_v61  ;;  %1541 = vmatpush3.bf16.msra.mxu1 %v1540_v0 }
 0x3e4   :  { %1514 = vmatprep.subr.bf16.mxu0 %v1513_v17  ;;  %1542 = vmatprep.subr.bf16.mxu1 %v1615_v28 }
 0x3e7   :  { %1516 = vmatpush1.bf16.msra.mxu0 %v1515_v49  ;;  %1544 = vmatpush3.bf16.msra.mxu1 %v1543_v38 }
 0x3e8   :  { %1518 = vmatprep.subr.bf16.mxu0 %v1517_v5  ;;  %1545 = vmatprep.subr.bf16.mxu1 %v1615_v28 }
 0x3eb   :  { %1520 = vmatpush1.bf16.msra.mxu0 %v1519_v22  ;;  %1547 = vmatpush3.bf16.msra.mxu1 %v1546_v26 }
 0x3ec   :  { %1522 = vmatprep.subr.bf16.mxu0 %v1521_v30  ;;  %1548 = vmatprep.subr.bf16.mxu1 %v1615_v28 }
 0x3ef   :  { %1524 = vmatpush1.bf16.msra.mxu0 %v1523_v35  ;;  %1550 = vmatpush3.bf16.msra.mxu1 %v1549_v37 }
 0x3f0   :  { %1526 = vmatprep.subr.bf16.mxu0 %v1525_v42  ;;  %1551 = vmatprep.subr.bf16.mxu1 %v1615_v28 }
 0x3f3   :  { %1528 = vmatpush1.bf16.msra.mxu0 %v1527_v50  ;;  %1553 = vmatpush3.bf16.msra.mxu1 %v1552_v1 }
 0x3f4   :  { %1530 = vmatprep.subr.bf16.mxu0 %v1529_v54  ;;  %1554 = vmatprep.subr.bf16.mxu1 %v1615_v28  ;;  %v973_v28 = vld [vmem:[%s2408_s8] sm:$0x7] }
 0x3f5   :  { %v978_v7 = vrot.slane %v973_v28, %v1744_v27  ;;  %v982_v23 = vrot.slane %v973_v28, %v1742_v25  ;;  %v1054_v27 = vrot.slane %v1041_v3, %v1746_v29  ;;  %v986_v25 = vrot.slane %v973_v28, %v1746_v29 }
 0x3f7   :  { %1532 = vmatpush1.bf16.msra.mxu0 %v1531_v60  ;;  %1556 = vmatpush3.bf16.msra.mxu1 %v1555_v62  ;;  %v1557_v18 = vadd.f32 %v1046_v51, %v978_v7  ;;  %v1559_v53 = vadd.f32 %v1050_v55, %v982_v23 }
 0x3fa   :  { %1123 = vmatmul.mubr.f32.vlgmr.msra.gmra.mrb[0].mxu0 %v1613_v63  ;;  %1387 = vmatmul.mubr.f32.vlgmr.msra.gmra.mrb[4].mxu1 %v1613_v63 }
 0x48d   :  { %v828_v2 = vpop.f32.mrb[0].mxu1 }
 0x48e   :  { %v1318_v15 = vpop.f32.mrb[1].mxu1 }
 0x4ad   :  { %v969_v41 = vpop.f32.mrb[2].mxu1 }
 0x4ae   :  { %v970_v45 = vadd.f32 %v969_v41, %v828_v2  ;;  %v1353_v4 = vpop.f32.mrb[3].mxu1 }
 0x4b0   :  { %v992_v5 = vadd.f32 %v986_v25, %v970_v45 }
 0x4cd   :  { %v1124_v9 = vpop.f32.mrb[0].mxu0  ;;  %v1195_v13 = vpop.f32.mrb[4].mxu1 }
 0x4ce   :  { %v1558_v61 = vadd.f32 %v1557_v18, %v1124_v9  ;;  %v1126_v39 = vpop.f32.mrb[1].mxu0  ;;  %v1388_v0 = vpop.f32.mrb[5].mxu1  ;;  %v1196_v14 = vadd.f32 %v1195_v13, %v1054_v27 }
 0x4cf   :  { %v1560_v6 = vadd.f32 %v1559_v53, %v1126_v39 }
 0x4d0   :  { %v1231_v17 = vmul.f32 -1.442695, %v1558_v61 }
 0x4d1   :  { %v1232_v40 = vmul.f32 -1.442695, %v1560_v6 }
 0x4d2   :  { %1603 = vpow2.f32 %v1231_v17 }
 0x4d3   :  { %1605 = vpow2.f32 %v1232_v40 }
 0x4dc   :  { %v1604_v43 = vpop.eup %1603 }
 0x4dd   :  { %v1203_v8 = vadd.f32 1.0, %v1604_v43  ;;  %v1606_v21 = vpop.eup %1605 }
 0x4de   :  { %v1210_v49 = vadd.f32 1.0, %v1606_v21 }
 0x4df   :  { %1607 = vrcp.f32 %v1203_v8 }
 0x4e0   :  { %1609 = vrcp.f32 %v1210_v49 }
 0x4e9   :  { %v1608_v38 = vpop.eup %1607 }
 0x4ea   :  { %v1213_v20 = vmul.f32 %v1608_v38, %v1196_v14  ;;  %v1610_v12 = vpop.eup %1609 }
 0x4eb   :  { %v1216_v16 = vsub.f32 1.0, %v1610_v12  ;;  %v1218_v22 = vmul.f32 %v1613_v63, %v1610_v12 }
 0x4ec   :  { %v1214_v59 = vadd.f32 %v1213_v20, %v992_v5 }
 0x4ee   :  { %1611 = vtanh.f32 %v1214_v59 }
 0x4f8   :  { %v1612_v11 = vpop.eup %1611 }
 0x4f9   :  { %v1217_v24 = vmul.f32 %v1612_v11, %v1216_v16 }
 0x4fb   :  { %v1219_v26 = vadd.f32 %v1218_v22, %v1217_v24 }
 0x4fd   :  { %1220 = vst [vmem:[%s2409_s11] sm:$0xff] %v1219_v26 }

</bundles_post_ra>
